<compile_context>
chip_gen: v7x
topology: tpu7x:2x2x1
jax: 0.10.0
libtpu: 0.0.40
codegen_flags: <defaults>
</compile_context>

<pallas_src>
import functools

import jax
import jax.numpy as jnp
from jax.experimental import pallas as pl
from jax.experimental.pallas import tpu as pltpu


# ----------------------------- fused Pallas kernel -----------------------------

def _shift_lanes(a, off):
    """y[:, i] = a[:, (i + off) % n] for a static integer off (lane-axis rotate)."""
    n = a.shape[-1]
    k = off % n
    if k == 0:
        return a
    return jnp.concatenate([a[:, k:], a[:, :k]], axis=1)


def _make_fused_kernel(batch, hp, wp, cin, cmid):
    """Builds the fused conv1+relu -> conv2+relu -> sum-pool -> fc kernel."""
    gpb = hp * wp                       # flattened padded pixels per image
    # flat-index offset of tap (kh, kw) relative to the (padded) output pixel
    offsets = [(kh - 1) * wp + (kw - 1) for kh in range(3) for kw in range(3)]

    def kernel(x_ref, mask_ref, w1_ref, b1_ref, w2_ref, b2_ref,
               fcw_ref, fcb_ref, o_ref):
        mask = mask_ref[...]                                    # (1, G)

        def conv3x3_relu(h, w_ref, b_ref):
            # h: (C, G) in padded-flattened layout (zero padding ring).
            # Accumulate the 9 taps as small MXU matmuls with a 648-wide
            # lane axis; rolled taps only pollute pad positions, which are
            # re-zeroed by `mask` below.
            c = h.shape[0]
            acc = jnp.zeros((w_ref.shape[0], h.shape[1]), jnp.float32)
            for t, off in enumerate(offsets):
                tap = _shift_lanes(h, off)                      # (C, G)
                acc = acc + jnp.dot(w_ref[:, t * c:(t + 1) * c], tap,
                                    preferred_element_type=jnp.float32)
            acc = jnp.maximum(acc + b_ref[...], 0.0)            # bias + ReLU (f32)
            # zero the padding ring: acts as zero-padding for the next conv
            # and keeps the global-sum pool exact.
            return acc * mask

        h1 = conv3x3_relu(x_ref[...], w1_ref, b1_ref)           # (Cmid, G)
        h2 = conv3x3_relu(h1, w2_ref, b2_ref)                   # (Cmid, G)

        # global sum pool per image (pad ring already zero) + linear head
        pooled = [jnp.sum(h2[:, b * gpb:(b + 1) * gpb], axis=1, keepdims=True)
                  for b in range(batch)]                        # B x (Cmid, 1)
        pooled = jnp.concatenate(pooled, axis=1)                # (Cmid, B)
        out = jnp.sum(pooled * fcw_ref[...], axis=0, keepdims=True)  # (1, B)
        o_ref[...] = out + fcb_ref[...]

    return kernel


# ------------------------------- wrapper / glue -------------------------------

def _weight_to_mat(w_oihw):
    # PyTorch conv weight (O, I, 3, 3) -> (O, 9*I); column index = (kh*3+kw)*I + i
    o, i = w_oihw.shape[0], w_oihw.shape[1]
    return jnp.transpose(w_oihw, (2, 3, 1, 0)).reshape(9 * i, o).T


def _interior_mask(batch, h, w):
    hp, wp = h + 2, w + 2
    rows = (jnp.arange(hp) >= 1) & (jnp.arange(hp) <= h)
    cols = (jnp.arange(wp) >= 1) & (jnp.arange(wp) <= w)
    m2d = (rows[:, None] & cols[None, :]).astype(jnp.float32)   # (Hp, Wp)
    return jnp.tile(m2d.reshape(1, hp * wp), (1, batch))        # (1, B*Hp*Wp)


def fused_forward(params, x_nchw):
    b, cin, h, w = x_nchw.shape
    hp, wp = h + 2, w + 2
    cmid = params['conv1.w'].shape[0]
    g = b * hp * wp

    # pad spatially, put channels on sublanes, flatten (B, Hp, Wp) onto lanes
    xp = jnp.pad(x_nchw.astype(jnp.float32), ((0, 0), (0, 0), (1, 1), (1, 1)))
    xflat = jnp.transpose(xp, (1, 0, 2, 3)).reshape(cin, g)     # (Cin, G)

    mask = _interior_mask(b, h, w)                              # (1, G)

    w1m = _weight_to_mat(params['conv1.w']).astype(jnp.float32)  # (Cmid, 9*Cin)
    w2m = _weight_to_mat(params['conv2.w']).astype(jnp.float32)  # (Cmid, 9*Cmid)
    b1 = params['conv1.b'].reshape(cmid, 1).astype(jnp.float32)
    b2 = params['conv2.b'].reshape(cmid, 1).astype(jnp.float32)
    fcw = params['fc.w'].reshape(1, cmid).T.astype(jnp.float32)  # (Cmid, 1)
    fcb = params['fc.b'].reshape(1, 1).astype(jnp.float32)

    kernel = _make_fused_kernel(b, hp, wp, cin, cmid)

    flops = (2 * b * h * w * 9 * cin * cmid          # conv1
             + 2 * b * h * w * 9 * cmid * cmid       # conv2
             + 2 * b * cmid)                         # fc head
    bytes_accessed = 4 * (cin * g + g + 9 * cin * cmid + 9 * cmid * cmid
                          + 2 * cmid + cmid + 1 + b)

    vmem_spec = pl.BlockSpec(memory_space=pltpu.MemorySpace.VMEM)
    out = pl.pallas_call(
        kernel,
        out_shape=jax.ShapeDtypeStruct((1, b), jnp.float32),
        in_specs=[vmem_spec] * 8,
        out_specs=vmem_spec,
        cost_estimate=pl.CostEstimate(flops=int(flops), transcendentals=0,
                                      bytes_accessed=int(bytes_accessed)),
    )(xflat, mask, w1m, b1, w2m, b2, fcw, fcb)
    return out.reshape(b, 1)


_fused_forward_jit = jax.jit(fused_forward)


# ------------------------- Regan_training equivalent ----------------------

class ReganTraining:
    """JAX port of SNGAN/regan.py::Regan_training wrapping a small conv model.

    Mask bookkeeping mirrors the PyTorch code exactly:
      update_masks(): mask = |w| < quantile(|w|, sparsity)   (True = small weight)
      apply_masks():  w    = w * (~mask)                     (zeroes SMALL weights)
    forward() does NOT apply masks (same as PyTorch: the training loop calls
    apply_masks() explicitly).
    """

    def __init__(self, params, sparsity, train_on_sparse=False):
        self.params = dict(params)
        self.sparsity = sparsity
        self.train_on_sparse = train_on_sparse
        self.names = list(self.params.keys())
        self.layers = [self.params[n] for n in self.names]
        self.masks = []
        self.reset_masks()

    def reset_masks(self):
        self.masks = [jnp.ones_like(w, dtype=bool) for w in self.layers]
        return self.masks

    def update_masks(self):
        self.masks = [jnp.abs(w) < jnp.quantile(jnp.abs(w), self.sparsity)
                      for w in self.layers]

    def turn_training_mode(self, mode):
        if mode == 'dense':
            self.train_on_sparse = False
        else:
            self.train_on_sparse = True
            self.update_masks()

    def apply_masks(self):
        self.layers = [w * (~m).astype(w.dtype)
                       for w, m in zip(self.layers, self.masks)]
        for n, w in zip(self.names, self.layers):
            self.params[n] = w

    def forward(self, x_nchw):
        return _fused_forward_jit(self.params, x_nchw)          # (B, 1)

    __call__ = forward


# --------------------------- pure-JAX reference ---------------------------

def reference_forward(params, x_nchw):
    x = jnp.transpose(x_nchw, (0, 2, 3, 1))
    dn = ('NHWC', 'HWIO', 'NHWC')

    def conv(h, w_oihw, b):
        w_hwio = jnp.transpose(w_oihw, (2, 3, 1, 0))
        y = jax.lax.conv_general_dilated(h, w_hwio, (1, 1), 'SAME',
                                         dimension_numbers=dn)
        return jax.nn.relu(y + b[None, None, None, :])

    h = conv(x, params['conv1.w'], params['conv1.b'])
    h = conv(h, params['conv2.w'], params['conv2.b'])
    pooled = jnp.sum(h, axis=(1, 2))                            # (B, C)
    return pooled @ params['fc.w'].T + params['fc.b'][None, :]


# ----------------------------------- main ----------------------------------

if __name__ == "__main__":
    key = jax.random.PRNGKey(0)
    k = jax.random.split(key, 8)

    B, Cin, H, W = 2, 4, 16, 16
    Ch = 8

    params = {
        'conv1.w': 0.1 * jax.random.normal(k[0], (Ch, Cin, 3, 3), jnp.float32),
        'conv1.b': 0.1 * jax.random.normal(k[1], (Ch,), jnp.float32),
        'conv2.w': 0.1 * jax.random.normal(k[2], (Ch, Ch, 3, 3), jnp.float32),
        'conv2.b': 0.1 * jax.random.normal(k[3], (Ch,), jnp.float32),
        'fc.w':    0.1 * jax.random.normal(k[4], (1, Ch), jnp.float32),
        'fc.b':    0.1 * jax.random.normal(k[5], (1,), jnp.float32),
    }

    x = jax.random.normal(k[6], (B, Cin, H, W), jnp.float32)    # NCHW input

    regan = ReganTraining(params, sparsity=0.5, train_on_sparse=False)

    out = regan(x)
    out = jax.block_until_ready(out)

    ref = reference_forward(params, x)
    assert out.shape == (B, 1)
    assert jnp.allclose(out, ref, atol=1e-4, rtol=1e-4), (out, ref)

    print("KERNEL_OK")
</pallas_src>

<mosaic_0001>
module attributes {stable_mosaic.version = 11 : i64} {
  func.func @kernel(%arg0: memref<4x648xf32, #tpu.memory_space<vmem>>, %arg1: memref<1x648xf32, #tpu.memory_space<vmem>>, %arg2: memref<8x36xf32, #tpu.memory_space<vmem>>, %arg3: memref<8x1xf32, #tpu.memory_space<vmem>>, %arg4: memref<8x72xf32, #tpu.memory_space<vmem>>, %arg5: memref<8x1xf32, #tpu.memory_space<vmem>>, %arg6: memref<8x1xf32, #tpu.memory_space<vmem>>, %arg7: memref<1x1xf32, #tpu.memory_space<vmem>>, %arg8: memref<1x2xf32, #tpu.memory_space<vmem>>) attributes {dimension_semantics = [], scalar_prefetch = 0 : i64, scratch_operands = 0 : i64, tpu.core_type = #tpu.core_type<tc>} {
    %c0 = arith.constant 0 : index
    %c0_0 = arith.constant 0 : index
    %0 = vector.load %arg1[%c0, %c0_0] : memref<1x648xf32, #tpu.memory_space<vmem>>, vector<1x648xf32>
    %c0_1 = arith.constant 0 : index
    %c0_2 = arith.constant 0 : index
    %1 = vector.load %arg0[%c0_1, %c0_2] : memref<4x648xf32, #tpu.memory_space<vmem>>, vector<4x648xf32>
    %cst = arith.constant 0.000000e+00 : f32
    %2 = vector.broadcast %cst : f32 to vector<8x648xf32>
    %3 = vector.extract_strided_slice %1 {offsets = [0, 629], sizes = [4, 19], strides = [1, 1]} : vector<4x648xf32> to vector<4x19xf32>
    %4 = vector.extract_strided_slice %1 {offsets = [0, 0], sizes = [4, 629], strides = [1, 1]} : vector<4x648xf32> to vector<4x629xf32>
    %5 = tpu.concatenate %3, %4 in 1 : vector<4x19xf32>, vector<4x629xf32> -> vector<4x648xf32>
    %c0_3 = arith.constant 0 : index
    %c0_4 = arith.constant 0 : index
    %6 = vector.load %arg2[%c0_3, %c0_4] : memref<8x36xf32, #tpu.memory_space<vmem>>, vector<8x4xf32>
    %cst_5 = arith.constant dense<0.000000e+00> : vector<8x648xf32>
    %7 = tpu.matmul %6, %5, %cst_5 {dimension_numbers = #tpu.dot_dimension_numbers<[1], [0], [0], [1], [0, 0, 1, 1], [], []>} : vector<8x4xf32>, vector<4x648xf32>, vector<8x648xf32> -> vector<8x648xf32>
    %8 = arith.addf %2, %7 : vector<8x648xf32>
    %9 = vector.extract_strided_slice %1 {offsets = [0, 630], sizes = [4, 18], strides = [1, 1]} : vector<4x648xf32> to vector<4x18xf32>
    %10 = vector.extract_strided_slice %1 {offsets = [0, 0], sizes = [4, 630], strides = [1, 1]} : vector<4x648xf32> to vector<4x630xf32>
    %11 = tpu.concatenate %9, %10 in 1 : vector<4x18xf32>, vector<4x630xf32> -> vector<4x648xf32>
    %c0_6 = arith.constant 0 : index
    %c4 = arith.constant 4 : index
    %12 = vector.load %arg2[%c0_6, %c4] : memref<8x36xf32, #tpu.memory_space<vmem>>, vector<8x4xf32>
    %cst_7 = arith.constant dense<0.000000e+00> : vector<8x648xf32>
    %13 = tpu.matmul %12, %11, %cst_7 {dimension_numbers = #tpu.dot_dimension_numbers<[1], [0], [0], [1], [0, 0, 1, 1], [], []>} : vector<8x4xf32>, vector<4x648xf32>, vector<8x648xf32> -> vector<8x648xf32>
    %14 = arith.addf %8, %13 : vector<8x648xf32>
    %15 = vector.extract_strided_slice %1 {offsets = [0, 631], sizes = [4, 17], strides = [1, 1]} : vector<4x648xf32> to vector<4x17xf32>
    %16 = vector.extract_strided_slice %1 {offsets = [0, 0], sizes = [4, 631], strides = [1, 1]} : vector<4x648xf32> to vector<4x631xf32>
    %17 = tpu.concatenate %15, %16 in 1 : vector<4x17xf32>, vector<4x631xf32> -> vector<4x648xf32>
    %c0_8 = arith.constant 0 : index
    %c8 = arith.constant 8 : index
    %18 = vector.load %arg2[%c0_8, %c8] : memref<8x36xf32, #tpu.memory_space<vmem>>, vector<8x4xf32>
    %cst_9 = arith.constant dense<0.000000e+00> : vector<8x648xf32>
    %19 = tpu.matmul %18, %17, %cst_9 {dimension_numbers = #tpu.dot_dimension_numbers<[1], [0], [0], [1], [0, 0, 1, 1], [], []>} : vector<8x4xf32>, vector<4x648xf32>, vector<8x648xf32> -> vector<8x648xf32>
    %20 = arith.addf %14, %19 : vector<8x648xf32>
    %21 = vector.extract_strided_slice %1 {offsets = [0, 647], sizes = [4, 1], strides = [1, 1]} : vector<4x648xf32> to vector<4x1xf32>
    %22 = vector.extract_strided_slice %1 {offsets = [0, 0], sizes = [4, 647], strides = [1, 1]} : vector<4x648xf32> to vector<4x647xf32>
    %23 = tpu.concatenate %21, %22 in 1 : vector<4x1xf32>, vector<4x647xf32> -> vector<4x648xf32>
    %c0_10 = arith.constant 0 : index
    %c12 = arith.constant 12 : index
    %24 = vector.load %arg2[%c0_10, %c12] : memref<8x36xf32, #tpu.memory_space<vmem>>, vector<8x4xf32>
    %cst_11 = arith.constant dense<0.000000e+00> : vector<8x648xf32>
    %25 = tpu.matmul %24, %23, %cst_11 {dimension_numbers = #tpu.dot_dimension_numbers<[1], [0], [0], [1], [0, 0, 1, 1], [], []>} : vector<8x4xf32>, vector<4x648xf32>, vector<8x648xf32> -> vector<8x648xf32>
    %26 = arith.addf %20, %25 : vector<8x648xf32>
    %c0_12 = arith.constant 0 : index
    %c16 = arith.constant 16 : index
    %27 = vector.load %arg2[%c0_12, %c16] : memref<8x36xf32, #tpu.memory_space<vmem>>, vector<8x4xf32>
    %cst_13 = arith.constant dense<0.000000e+00> : vector<8x648xf32>
    %28 = tpu.matmul %27, %1, %cst_13 {dimension_numbers = #tpu.dot_dimension_numbers<[1], [0], [0], [1], [0, 0, 1, 1], [], []>} : vector<8x4xf32>, vector<4x648xf32>, vector<8x648xf32> -> vector<8x648xf32>
    %29 = arith.addf %26, %28 : vector<8x648xf32>
    %30 = vector.extract_strided_slice %1 {offsets = [0, 1], sizes = [4, 647], strides = [1, 1]} : vector<4x648xf32> to vector<4x647xf32>
    %31 = vector.extract_strided_slice %1 {offsets = [0, 0], sizes = [4, 1], strides = [1, 1]} : vector<4x648xf32> to vector<4x1xf32>
    %32 = tpu.concatenate %30, %31 in 1 : vector<4x647xf32>, vector<4x1xf32> -> vector<4x648xf32>
    %c0_14 = arith.constant 0 : index
    %c20 = arith.constant 20 : index
    %33 = vector.load %arg2[%c0_14, %c20] : memref<8x36xf32, #tpu.memory_space<vmem>>, vector<8x4xf32>
    %cst_15 = arith.constant dense<0.000000e+00> : vector<8x648xf32>
    %34 = tpu.matmul %33, %32, %cst_15 {dimension_numbers = #tpu.dot_dimension_numbers<[1], [0], [0], [1], [0, 0, 1, 1], [], []>} : vector<8x4xf32>, vector<4x648xf32>, vector<8x648xf32> -> vector<8x648xf32>
    %35 = arith.addf %29, %34 : vector<8x648xf32>
    %36 = vector.extract_strided_slice %1 {offsets = [0, 17], sizes = [4, 631], strides = [1, 1]} : vector<4x648xf32> to vector<4x631xf32>
    %37 = vector.extract_strided_slice %1 {offsets = [0, 0], sizes = [4, 17], strides = [1, 1]} : vector<4x648xf32> to vector<4x17xf32>
    %38 = tpu.concatenate %36, %37 in 1 : vector<4x631xf32>, vector<4x17xf32> -> vector<4x648xf32>
    %c0_16 = arith.constant 0 : index
    %c24 = arith.constant 24 : index
    %39 = vector.load %arg2[%c0_16, %c24] : memref<8x36xf32, #tpu.memory_space<vmem>>, vector<8x4xf32>
    %cst_17 = arith.constant dense<0.000000e+00> : vector<8x648xf32>
    %40 = tpu.matmul %39, %38, %cst_17 {dimension_numbers = #tpu.dot_dimension_numbers<[1], [0], [0], [1], [0, 0, 1, 1], [], []>} : vector<8x4xf32>, vector<4x648xf32>, vector<8x648xf32> -> vector<8x648xf32>
    %41 = arith.addf %35, %40 : vector<8x648xf32>
    %42 = vector.extract_strided_slice %1 {offsets = [0, 18], sizes = [4, 630], strides = [1, 1]} : vector<4x648xf32> to vector<4x630xf32>
    %43 = vector.extract_strided_slice %1 {offsets = [0, 0], sizes = [4, 18], strides = [1, 1]} : vector<4x648xf32> to vector<4x18xf32>
    %44 = tpu.concatenate %42, %43 in 1 : vector<4x630xf32>, vector<4x18xf32> -> vector<4x648xf32>
    %c0_18 = arith.constant 0 : index
    %c28 = arith.constant 28 : index
    %45 = vector.load %arg2[%c0_18, %c28] : memref<8x36xf32, #tpu.memory_space<vmem>>, vector<8x4xf32>
    %cst_19 = arith.constant dense<0.000000e+00> : vector<8x648xf32>
    %46 = tpu.matmul %45, %44, %cst_19 {dimension_numbers = #tpu.dot_dimension_numbers<[1], [0], [0], [1], [0, 0, 1, 1], [], []>} : vector<8x4xf32>, vector<4x648xf32>, vector<8x648xf32> -> vector<8x648xf32>
    %47 = arith.addf %41, %46 : vector<8x648xf32>
    %48 = vector.extract_strided_slice %1 {offsets = [0, 19], sizes = [4, 629], strides = [1, 1]} : vector<4x648xf32> to vector<4x629xf32>
    %49 = vector.extract_strided_slice %1 {offsets = [0, 0], sizes = [4, 19], strides = [1, 1]} : vector<4x648xf32> to vector<4x19xf32>
    %50 = tpu.concatenate %48, %49 in 1 : vector<4x629xf32>, vector<4x19xf32> -> vector<4x648xf32>
    %c0_20 = arith.constant 0 : index
    %c32 = arith.constant 32 : index
    %51 = vector.load %arg2[%c0_20, %c32] : memref<8x36xf32, #tpu.memory_space<vmem>>, vector<8x4xf32>
    %cst_21 = arith.constant dense<0.000000e+00> : vector<8x648xf32>
    %52 = tpu.matmul %51, %50, %cst_21 {dimension_numbers = #tpu.dot_dimension_numbers<[1], [0], [0], [1], [0, 0, 1, 1], [], []>} : vector<8x4xf32>, vector<4x648xf32>, vector<8x648xf32> -> vector<8x648xf32>
    %53 = arith.addf %47, %52 : vector<8x648xf32>
    %c0_22 = arith.constant 0 : index
    %c0_23 = arith.constant 0 : index
    %54 = vector.load %arg3[%c0_22, %c0_23] : memref<8x1xf32, #tpu.memory_space<vmem>>, vector<8x1xf32>
    %55 = vector.broadcast %54 : vector<8x1xf32> to vector<8x648xf32>
    %56 = arith.addf %53, %55 : vector<8x648xf32>
    %cst_24 = arith.constant 0.000000e+00 : f32
    %57 = vector.broadcast %cst_24 : f32 to vector<8x648xf32>
    %58 = arith.maximumf %56, %57 : vector<8x648xf32>
    %59 = vector.broadcast %0 : vector<1x648xf32> to vector<8x648xf32>
    %60 = arith.mulf %58, %59 : vector<8x648xf32>
    %cst_25 = arith.constant 0.000000e+00 : f32
    %61 = vector.broadcast %cst_25 : f32 to vector<8x648xf32>
    %62 = vector.extract_strided_slice %60 {offsets = [0, 629], sizes = [8, 19], strides = [1, 1]} : vector<8x648xf32> to vector<8x19xf32>
    %63 = vector.extract_strided_slice %60 {offsets = [0, 0], sizes = [8, 629], strides = [1, 1]} : vector<8x648xf32> to vector<8x629xf32>
    %64 = tpu.concatenate %62, %63 in 1 : vector<8x19xf32>, vector<8x629xf32> -> vector<8x648xf32>
    %c0_26 = arith.constant 0 : index
    %c0_27 = arith.constant 0 : index
    %65 = vector.load %arg4[%c0_26, %c0_27] : memref<8x72xf32, #tpu.memory_space<vmem>>, vector<8x8xf32>
    %cst_28 = arith.constant dense<0.000000e+00> : vector<8x648xf32>
    %66 = tpu.matmul %65, %64, %cst_28 {dimension_numbers = #tpu.dot_dimension_numbers<[1], [0], [0], [1], [0, 0, 1, 1], [], []>} : vector<8x8xf32>, vector<8x648xf32>, vector<8x648xf32> -> vector<8x648xf32>
    %67 = arith.addf %61, %66 : vector<8x648xf32>
    %68 = vector.extract_strided_slice %60 {offsets = [0, 630], sizes = [8, 18], strides = [1, 1]} : vector<8x648xf32> to vector<8x18xf32>
    %69 = vector.extract_strided_slice %60 {offsets = [0, 0], sizes = [8, 630], strides = [1, 1]} : vector<8x648xf32> to vector<8x630xf32>
    %70 = tpu.concatenate %68, %69 in 1 : vector<8x18xf32>, vector<8x630xf32> -> vector<8x648xf32>
    %c0_29 = arith.constant 0 : index
    %c8_30 = arith.constant 8 : index
    %71 = vector.load %arg4[%c0_29, %c8_30] : memref<8x72xf32, #tpu.memory_space<vmem>>, vector<8x8xf32>
    %cst_31 = arith.constant dense<0.000000e+00> : vector<8x648xf32>
    %72 = tpu.matmul %71, %70, %cst_31 {dimension_numbers = #tpu.dot_dimension_numbers<[1], [0], [0], [1], [0, 0, 1, 1], [], []>} : vector<8x8xf32>, vector<8x648xf32>, vector<8x648xf32> -> vector<8x648xf32>
    %73 = arith.addf %67, %72 : vector<8x648xf32>
    %74 = vector.extract_strided_slice %60 {offsets = [0, 631], sizes = [8, 17], strides = [1, 1]} : vector<8x648xf32> to vector<8x17xf32>
    %75 = vector.extract_strided_slice %60 {offsets = [0, 0], sizes = [8, 631], strides = [1, 1]} : vector<8x648xf32> to vector<8x631xf32>
    %76 = tpu.concatenate %74, %75 in 1 : vector<8x17xf32>, vector<8x631xf32> -> vector<8x648xf32>
    %c0_32 = arith.constant 0 : index
    %c16_33 = arith.constant 16 : index
    %77 = vector.load %arg4[%c0_32, %c16_33] : memref<8x72xf32, #tpu.memory_space<vmem>>, vector<8x8xf32>
    %cst_34 = arith.constant dense<0.000000e+00> : vector<8x648xf32>
    %78 = tpu.matmul %77, %76, %cst_34 {dimension_numbers = #tpu.dot_dimension_numbers<[1], [0], [0], [1], [0, 0, 1, 1], [], []>} : vector<8x8xf32>, vector<8x648xf32>, vector<8x648xf32> -> vector<8x648xf32>
    %79 = arith.addf %73, %78 : vector<8x648xf32>
    %80 = vector.extract_strided_slice %60 {offsets = [0, 647], sizes = [8, 1], strides = [1, 1]} : vector<8x648xf32> to vector<8x1xf32>
    %81 = vector.extract_strided_slice %60 {offsets = [0, 0], sizes = [8, 647], strides = [1, 1]} : vector<8x648xf32> to vector<8x647xf32>
    %82 = tpu.concatenate %80, %81 in 1 : vector<8x1xf32>, vector<8x647xf32> -> vector<8x648xf32>
    %c0_35 = arith.constant 0 : index
    %c24_36 = arith.constant 24 : index
    %83 = vector.load %arg4[%c0_35, %c24_36] : memref<8x72xf32, #tpu.memory_space<vmem>>, vector<8x8xf32>
    %cst_37 = arith.constant dense<0.000000e+00> : vector<8x648xf32>
    %84 = tpu.matmul %83, %82, %cst_37 {dimension_numbers = #tpu.dot_dimension_numbers<[1], [0], [0], [1], [0, 0, 1, 1], [], []>} : vector<8x8xf32>, vector<8x648xf32>, vector<8x648xf32> -> vector<8x648xf32>
    %85 = arith.addf %79, %84 : vector<8x648xf32>
    %c0_38 = arith.constant 0 : index
    %c32_39 = arith.constant 32 : index
    %86 = vector.load %arg4[%c0_38, %c32_39] : memref<8x72xf32, #tpu.memory_space<vmem>>, vector<8x8xf32>
    %cst_40 = arith.constant dense<0.000000e+00> : vector<8x648xf32>
    %87 = tpu.matmul %86, %60, %cst_40 {dimension_numbers = #tpu.dot_dimension_numbers<[1], [0], [0], [1], [0, 0, 1, 1], [], []>} : vector<8x8xf32>, vector<8x648xf32>, vector<8x648xf32> -> vector<8x648xf32>
    %88 = arith.addf %85, %87 : vector<8x648xf32>
    %89 = vector.extract_strided_slice %60 {offsets = [0, 1], sizes = [8, 647], strides = [1, 1]} : vector<8x648xf32> to vector<8x647xf32>
    %90 = vector.extract_strided_slice %60 {offsets = [0, 0], sizes = [8, 1], strides = [1, 1]} : vector<8x648xf32> to vector<8x1xf32>
    %91 = tpu.concatenate %89, %90 in 1 : vector<8x647xf32>, vector<8x1xf32> -> vector<8x648xf32>
    %c0_41 = arith.constant 0 : index
    %c40 = arith.constant 40 : index
    %92 = vector.load %arg4[%c0_41, %c40] : memref<8x72xf32, #tpu.memory_space<vmem>>, vector<8x8xf32>
    %cst_42 = arith.constant dense<0.000000e+00> : vector<8x648xf32>
    %93 = tpu.matmul %92, %91, %cst_42 {dimension_numbers = #tpu.dot_dimension_numbers<[1], [0], [0], [1], [0, 0, 1, 1], [], []>} : vector<8x8xf32>, vector<8x648xf32>, vector<8x648xf32> -> vector<8x648xf32>
    %94 = arith.addf %88, %93 : vector<8x648xf32>
    %95 = vector.extract_strided_slice %60 {offsets = [0, 17], sizes = [8, 631], strides = [1, 1]} : vector<8x648xf32> to vector<8x631xf32>
    %96 = vector.extract_strided_slice %60 {offsets = [0, 0], sizes = [8, 17], strides = [1, 1]} : vector<8x648xf32> to vector<8x17xf32>
    %97 = tpu.concatenate %95, %96 in 1 : vector<8x631xf32>, vector<8x17xf32> -> vector<8x648xf32>
    %c0_43 = arith.constant 0 : index
    %c48 = arith.constant 48 : index
    %98 = vector.load %arg4[%c0_43, %c48] : memref<8x72xf32, #tpu.memory_space<vmem>>, vector<8x8xf32>
    %cst_44 = arith.constant dense<0.000000e+00> : vector<8x648xf32>
    %99 = tpu.matmul %98, %97, %cst_44 {dimension_numbers = #tpu.dot_dimension_numbers<[1], [0], [0], [1], [0, 0, 1, 1], [], []>} : vector<8x8xf32>, vector<8x648xf32>, vector<8x648xf32> -> vector<8x648xf32>
    %100 = arith.addf %94, %99 : vector<8x648xf32>
    %101 = vector.extract_strided_slice %60 {offsets = [0, 18], sizes = [8, 630], strides = [1, 1]} : vector<8x648xf32> to vector<8x630xf32>
    %102 = vector.extract_strided_slice %60 {offsets = [0, 0], sizes = [8, 18], strides = [1, 1]} : vector<8x648xf32> to vector<8x18xf32>
    %103 = tpu.concatenate %101, %102 in 1 : vector<8x630xf32>, vector<8x18xf32> -> vector<8x648xf32>
    %c0_45 = arith.constant 0 : index
    %c56 = arith.constant 56 : index
    %104 = vector.load %arg4[%c0_45, %c56] : memref<8x72xf32, #tpu.memory_space<vmem>>, vector<8x8xf32>
    %cst_46 = arith.constant dense<0.000000e+00> : vector<8x648xf32>
    %105 = tpu.matmul %104, %103, %cst_46 {dimension_numbers = #tpu.dot_dimension_numbers<[1], [0], [0], [1], [0, 0, 1, 1], [], []>} : vector<8x8xf32>, vector<8x648xf32>, vector<8x648xf32> -> vector<8x648xf32>
    %106 = arith.addf %100, %105 : vector<8x648xf32>
    %107 = vector.extract_strided_slice %60 {offsets = [0, 19], sizes = [8, 629], strides = [1, 1]} : vector<8x648xf32> to vector<8x629xf32>
    %108 = vector.extract_strided_slice %60 {offsets = [0, 0], sizes = [8, 19], strides = [1, 1]} : vector<8x648xf32> to vector<8x19xf32>
    %109 = tpu.concatenate %107, %108 in 1 : vector<8x629xf32>, vector<8x19xf32> -> vector<8x648xf32>
    %c0_47 = arith.constant 0 : index
    %c64 = arith.constant 64 : index
    %110 = vector.load %arg4[%c0_47, %c64] : memref<8x72xf32, #tpu.memory_space<vmem>>, vector<8x8xf32>
    %cst_48 = arith.constant dense<0.000000e+00> : vector<8x648xf32>
    %111 = tpu.matmul %110, %109, %cst_48 {dimension_numbers = #tpu.dot_dimension_numbers<[1], [0], [0], [1], [0, 0, 1, 1], [], []>} : vector<8x8xf32>, vector<8x648xf32>, vector<8x648xf32> -> vector<8x648xf32>
    %112 = arith.addf %106, %111 : vector<8x648xf32>
    %c0_49 = arith.constant 0 : index
    %c0_50 = arith.constant 0 : index
    %113 = vector.load %arg5[%c0_49, %c0_50] : memref<8x1xf32, #tpu.memory_space<vmem>>, vector<8x1xf32>
    %114 = vector.broadcast %113 : vector<8x1xf32> to vector<8x648xf32>
    %115 = arith.addf %112, %114 : vector<8x648xf32>
    %cst_51 = arith.constant 0.000000e+00 : f32
    %116 = vector.broadcast %cst_51 : f32 to vector<8x648xf32>
    %117 = arith.maximumf %115, %116 : vector<8x648xf32>
    %118 = vector.broadcast %0 : vector<1x648xf32> to vector<8x648xf32>
    %119 = arith.mulf %117, %118 : vector<8x648xf32>
    %120 = vector.extract_strided_slice %119 {offsets = [0, 0], sizes = [8, 324], strides = [1, 1]} : vector<8x648xf32> to vector<8x324xf32>
    %cst_52 = arith.constant dense<0.000000e+00> : vector<8xf32>
    %121 = vector.multi_reduction <add>, %120, %cst_52 [1] : vector<8x324xf32> to vector<8xf32>
    %122 = vector.shape_cast %121 : vector<8xf32> to vector<8x1xf32>
    %123 = vector.extract_strided_slice %119 {offsets = [0, 324], sizes = [8, 324], strides = [1, 1]} : vector<8x648xf32> to vector<8x324xf32>
    %cst_53 = arith.constant dense<0.000000e+00> : vector<8xf32>
    %124 = vector.multi_reduction <add>, %123, %cst_53 [1] : vector<8x324xf32> to vector<8xf32>
    %125 = vector.shape_cast %124 : vector<8xf32> to vector<8x1xf32>
    %126 = tpu.concatenate %122, %125 in 1 : vector<8x1xf32>, vector<8x1xf32> -> vector<8x2xf32>
    %c0_54 = arith.constant 0 : index
    %c0_55 = arith.constant 0 : index
    %127 = vector.load %arg6[%c0_54, %c0_55] : memref<8x1xf32, #tpu.memory_space<vmem>>, vector<8x1xf32>
    %128 = vector.broadcast %127 : vector<8x1xf32> to vector<8x2xf32>
    %129 = arith.mulf %126, %128 : vector<8x2xf32>
    %cst_56 = arith.constant dense<0.000000e+00> : vector<2xf32>
    %130 = vector.multi_reduction <add>, %129, %cst_56 [0] : vector<8x2xf32> to vector<2xf32>
    %131 = vector.shape_cast %130 : vector<2xf32> to vector<1x2xf32>
    %c0_57 = arith.constant 0 : index
    %c0_58 = arith.constant 0 : index
    %132 = vector.load %arg7[%c0_57, %c0_58] : memref<1x1xf32, #tpu.memory_space<vmem>>, vector<1x1xf32>
    %133 = vector.broadcast %132 : vector<1x1xf32> to vector<1x2xf32>
    %134 = arith.addf %131, %133 : vector<1x2xf32>
    %c0_59 = arith.constant 0 : index
    %c0_60 = arith.constant 0 : index
    %135 = vector.load %arg8[%c0_59, %c0_60] : memref<1x2xf32, #tpu.memory_space<vmem>>, vector<1x2xf32>
    tpu.vector_store %arg8[%c0_59, %c0_60], %134 {strides = array<i32>} : memref<1x2xf32, #tpu.memory_space<vmem>>, vector<1x2xf32>,
    return
  }
}

</mosaic_0001>

<bundles_post_ra>
// kernel: fused_forward.1
= control target key start
LH: loop header
LB: loop body
LE: loop exit
PB: predicated region body
PF: predicated region fallthrough
CT: control target
= control target key end

     0   :  { %s5706_s0 = inlined_call_operand.vmem [shape: f32[4,648], index: 0, kind: input, shape index: {}]   ;;  %s5707_s1 = inlined_call_operand.vmem [shape: f32[1,648], index: 1, kind: input, shape index: {}]   ;;  %s5708_s2 = inlined_call_operand.vmem [shape: f32[8,36], index: 2, kind: input, shape index: {}]   ;;  %s5709_s3 = inlined_call_operand.vmem [shape: f32[8,1], index: 3, kind: input, shape index: {}]   ;;  %s5710_s4 = inlined_call_operand.vmem [shape: f32[8,72], index: 4, kind: input, shape index: {}]   ;;  %s5711_s5 = inlined_call_operand.vmem [shape: f32[8,1], index: 5, kind: input, shape index: {}]   ;;  %s5712_s6 = inlined_call_operand.vmem [shape: f32[8,1], index: 6, kind: input, shape index: {}]   ;;  %s5713_s7 = inlined_call_operand.<no memory space> [shape: f32[1,1], index: 7, kind: input, shape index: {}]   ;;  %s5714_s8 = inlined_call_operand.hbm [shape: f32[1,2], index: 8, kind: output, shape index: {}]  }
   0x1   :  { %v13_v0 = vstv %s5713_s7 }
   0x2   :  { %14 = vst [vmem:[#allocation2] sm:$0x1] %v13_v0 }
   0x3   :  { %v5073_v1 = vld [vmem:[%s5706_s0 + $0x10] sm:$0xff]  ;;  %v5078_v2 = vld [vmem:[%s5706_s0] sm:$0xff]  ;;  %s4990_s11 = smov 10   ;;  %s4991_s12 = smov 18  }
   0x4   :  { %67 = vrot.lane.b32.xlu0 %v5073_v1, %s4990_s11  ;;  %74 = vrot.lane.b32.xlu1 %v5078_v2, %s4991_s12  ;;  %v5086_v3 = vcombine.high %v5073_v1, %v5073_v1  ;;  %v5090_v4 = vcombine.high %v5078_v2, %v5078_v2 }
   0x5   :  { %15 = vsyncpa [#allocation4], 0  ;;  %v4992_v5 = vmov 0.0   ;;  %v5101_v6 = vld [vmem:[%s5708_s2] sm:$0xff]  ;;  %v5106_v7 = vld [vmem:[%s5706_s0 + $0x8] sm:$0xff]  ;;  %s4993_s16 = smov 124  }
   0x6   :  { %175 = vmatprep.mubr.f32.mxu0 %v4992_v5  ;;  %2544 = vmatprep.mubr.f32.mxu1 %v4992_v5  ;;  %v5113_v8 = vcombine.high %v5106_v7, %v5106_v7  ;;  %s4994_s2 = smov 11   ;;  %s4995_s0 = smov 19   ;;  %v5013_v11 = vmov 0   ;;  %vm71_vm0 = vcmask 80896   ;;  %vm84_vm1 = vcmask 146432   ;;  %v2358_v19 = vld [vmem:[%s5709_s3] sm:$0xff] }
   0x7   :  { %s4996_s17 = smov 9   ;;  %s4997_s18 = smov 17   ;;  %4961 = vset.pattern.permute.xlu0 %v5013_v11  ;;  %4962 = vset.pattern.permute.xlu1 %v5013_v11  ;;  %vm97_vm2 = vcmask 1043456   ;;  %vm94_vm3 = vcmask 31744   ;;  %vm42_vm4 = vcmask 89088   ;;  %vm59_vm5 = vcmask 154624  }
   0x8   :  { %69 = vrot.lane.b32.xlu0 %v5086_v3, %s4990_s11  ;;  %76 = vrot.lane.b32.xlu1 %v5090_v4, %s4991_s12  ;;  %s4998_s19 = smov 120   ;;  %s4999_s20 = smov 1   ;;  %vm556_vm6 = vcmask 72704   ;;  %vm569_vm7 = vcmask 138240   ;;  %vm829_vm8 = vcmask 7168   ;;  %vm1322_vm9 = vcmask 1039360  }
   0x9   :  { %s5000_s21 = smov 121   ;;  %s5001_s22 = smov 116   ;;  %vm1332_vm10 = vcmask 56320   ;;  %vm1584_vm11 = vcmask 908288   ;;  %vm1594_vm12 = vcmask 973824   ;;  %vm1846_vm13 = vcmask 900096  }
   0xa   :  { %s5002_s23 = smov 112   ;;  %s5003_s24 = smov 127   ;;  %vm5715_vm14 = vcmask 965632   ;;  %vm2108_vm15 = vcmask 891904  }
   0xb   :  { %s5004_s25 = smov 108   ;;  %s5005_s26 = smov 7  }
   0xc   :  { %92 = vrot.lane.b32.xlu0 %v5101_v6, %s4993_s16  ;;  %78 = vrot.lane.b32.xlu1 %v5106_v7, %s4991_s12  ;;  %s5006_s27 = smov 111   ;;  %s5007_s28 = smov 104  }
   0xd   :  { %s5008_s29 = smov 119   ;;  %s5009_s30 = smov 110  }
   0xe   :  { %s5010_s9 = smov 100   ;;  %s5011_s10 = smov 118  }
   0xf   :  { %s5012_s7 = smov 109   ;;  %s5014_s13 = smov 96  }
  0x10   :  { %80 = vrot.lane.b32.xlu0 %v5113_v8, %s4991_s12  ;;  %82 = vrot.lane.b32.xlu1 %v5073_v1, %s4991_s12  ;;  %s5015_s14 = smov 117  }
  0x14   :  { %38 = vrot.lane.b32.xlu0 %v5073_v1, %s4994_s2  ;;  %40 = vrot.lane.b32.xlu1 %v5086_v3, %s4994_s2 }
  0x18   :  { %49 = vrot.lane.b32.xlu0 %v5078_v2, %s4995_s0  ;;  %51 = vrot.lane.b32.xlu1 %v5090_v4, %s4995_s0 }
  0x1c   :  { %53 = vrot.lane.b32.xlu0 %v5106_v7, %s4995_s0  ;;  %55 = vrot.lane.b32.xlu1 %v5113_v8, %s4995_s0 }
  0x20   :  { %57 = vrot.lane.b32.xlu0 %v5073_v1, %s4995_s0  ;;  %552 = vrot.lane.b32.xlu1 %v5073_v1, %s4996_s17 }
  0x24   :  { %554 = vrot.lane.b32.xlu0 %v5086_v3, %s4996_s17  ;;  %559 = vrot.lane.b32.xlu1 %v5078_v2, %s4997_s18 }
  0x28   :  { %561 = vrot.lane.b32.xlu0 %v5090_v4, %s4997_s18  ;;  %578 = vrot.lane.b32.xlu1 %v5101_v6, %s4998_s19 }
  0x2c   :  { %563 = vrot.lane.b32.xlu0 %v5106_v7, %s4997_s18  ;;  %565 = vrot.lane.b32.xlu1 %v5113_v8, %s4997_s18 }
  0x30   :  { %567 = vrot.lane.b32.xlu0 %v5073_v1, %s4997_s18  ;;  %817 = vrot.lane.b32.xlu1 %v5078_v2, %s4999_s20 }
  0x34   :  { %819 = vrot.lane.b32.xlu0 %v5090_v4, %s4999_s20  ;;  %814 = vrot.lane.b32.xlu1 %v5086_v3, %s5000_s21 }
  0x38   :  { %839 = vrot.lane.b32.xlu0 %v5101_v6, %s5001_s22  ;;  %821 = vrot.lane.b32.xlu1 %v5106_v7, %s4999_s20 }
  0x3c   :  { %823 = vrot.lane.b32.xlu0 %v5113_v8, %s4999_s20  ;;  %825 = vrot.lane.b32.xlu1 %v5073_v1, %s4999_s20 }
  0x40   :  { %827 = vrot.lane.b32.xlu0 %v5086_v3, %s4999_s20  ;;  %1075 = vrot.lane.b32.xlu1 %v5101_v6, %s5002_s23 }
  0x44   :  { %1312 = vrot.lane.b32.xlu0 %v5090_v4, %s5003_s24  ;;  %1314 = vrot.lane.b32.xlu1 %v5106_v7, %s5003_s24 }
  0x48   :  { %1310 = vrot.lane.b32.xlu0 %v5078_v2, %s5003_s24  ;;  %1336 = vrot.lane.b32.xlu1 %v5101_v6, %s5004_s25 }
  0x4c   :  { %1316 = vrot.lane.b32.xlu0 %v5113_v8, %s5003_s24  ;;  %1318 = vrot.lane.b32.xlu1 %v5073_v1, %s5003_s24 }
  0x50   :  { %1320 = vrot.lane.b32.xlu0 %v5086_v3, %s5003_s24  ;;  %1329 = vrot.lane.b32.xlu1 %v5078_v2, %s5005_s26 }
  0x54   :  { %1574 = vrot.lane.b32.xlu0 %v5090_v4, %s5006_s27  ;;  %1576 = vrot.lane.b32.xlu1 %v5106_v7, %s5006_s27 }
  0x58   :  { %1572 = vrot.lane.b32.xlu0 %v5078_v2, %s5006_s27  ;;  %1598 = vrot.lane.b32.xlu1 %v5101_v6, %s5007_s28 }
  0x5c   :  { %1578 = vrot.lane.b32.xlu0 %v5113_v8, %s5006_s27  ;;  %1580 = vrot.lane.b32.xlu1 %v5073_v1, %s5006_s27 }
  0x60   :  { %1582 = vrot.lane.b32.xlu0 %v5086_v3, %s5006_s27  ;;  %1591 = vrot.lane.b32.xlu1 %v5078_v2, %s5008_s29 }
  0x64   :  { %1836 = vrot.lane.b32.xlu0 %v5090_v4, %s5009_s30  ;;  %1838 = vrot.lane.b32.xlu1 %v5106_v7, %s5009_s30 }
  0x68   :  { %1834 = vrot.lane.b32.xlu0 %v5078_v2, %s5009_s30  ;;  %1860 = vrot.lane.b32.xlu1 %v5101_v6, %s5010_s9 }
  0x6c   :  { %1840 = vrot.lane.b32.xlu0 %v5113_v8, %s5009_s30  ;;  %1842 = vrot.lane.b32.xlu1 %v5073_v1, %s5009_s30 }
  0x70   :  { %1844 = vrot.lane.b32.xlu0 %v5086_v3, %s5009_s30  ;;  %1853 = vrot.lane.b32.xlu1 %v5078_v2, %s5011_s10 }
  0x74   :  { %2098 = vrot.lane.b32.xlu0 %v5090_v4, %s5012_s7  ;;  %2100 = vrot.lane.b32.xlu1 %v5106_v7, %s5012_s7 }
  0x76   :  { %v68_v9 = vpop.permute.xlu0 %67  ;;  %v75_v10 = vpop.permute.xlu1 %74 }
  0x78   :  { %2096 = vrot.lane.b32.xlu0 %v5078_v2, %s5012_s7  ;;  %2122 = vrot.lane.b32.xlu1 %v5101_v6, %s5014_s13 }
  0x7a   :  { %v70_v12 = vpop.permute.xlu0 %69  ;;  %v77_v13 = vpop.permute.xlu1 %76 }
  0x7b   :  { %v72_v14 = vsel %vm71_vm0, %v68_v9, %v70_v12  ;;  %v85_v15 = vsel %vm84_vm1, %v75_v10, %v77_v13 }
  0x7c   :  { %2102 = vrot.lane.b32.xlu0 %v5113_v8, %s5012_s7  ;;  %2104 = vrot.lane.b32.xlu1 %v5073_v1, %s5012_s7  ;;  %v90_v16 = vsel %vm84_vm1, %v72_v14, %v75_v10 }
  0x7d   :  { %4725 = vmatprep.subr.msk.mxu0 %vm97_vm2, %v85_v15 }
  0x7e   :  { %4726 = vmatpush1.msk.msra.mxu0 %vm97_vm2, %v90_v16  ;;  %v93_v17 = vpop.permute.xlu0 %92  ;;  %v79_v18 = vpop.permute.xlu1 %78 }
  0x7f   :  { %4727 = vmatmul.mubr.msk.f32.vlgmr.msra.gmra.mrb[0].mxu0 %vm94_vm3, %v93_v17  ;;  %v86_v23 = vsel %vm84_vm1, %v77_v13, %v79_v18 }
  0x80   :  { %2106 = vrot.lane.b32.xlu0 %v5086_v3, %s5012_s7  ;;  %2115 = vrot.lane.b32.xlu1 %v5078_v2, %s5015_s14 }
  0x81   :  { %246 = vmatprep.mubr.f32.mxu0 %v4992_v5 }
  0x82   :  { %v81_v20 = vpop.permute.xlu0 %80  ;;  %v83_v21 = vpop.permute.xlu1 %82 }
  0x83   :  { %v87_v22 = vsel %vm84_vm1, %v79_v18, %v81_v20  ;;  %v88_v24 = vsel %vm84_vm1, %v81_v20, %v83_v21 }
  0x84   :  { %4728 = vmatprep.subr.msk.mxu0 %vm97_vm2, %v87_v22  ;;  %2361 = vperm.xlu0 %4961, %v2358_v19  }
  0x85   :  { %4729 = vmatpush1.msk.msra.mxu0 %vm97_vm2, %v86_v23 }
  0x86   :  { %v39_v25 = vpop.permute.xlu0 %38  ;;  %4730 = vmatmul.mubr.msk.f32.vlgmr.msra.gmra.mrb[2].mxu0 %vm94_vm3, %v93_v17  ;;  %4731 = vmatprep.subr.msk.mxu0 %vm97_vm2, %v83_v21  ;;  %v41_v26 = vpop.permute.xlu1 %40 }
  0x87   :  { %4732 = vmatpush1.msk.msra.mxu0 %vm97_vm2, %v88_v24  ;;  %317 = vmatprep.mubr.f32.mxu0 %v4992_v5  ;;  %v43_v27 = vsel %vm42_vm4, %v39_v25, %v41_v26 }
  0x8a   :  { %v50_v28 = vpop.permute.xlu0 %49  ;;  %4733 = vmatmul.mubr.msk.f32.vlgmr.msra.gmra.mrb[4].mxu0 %vm94_vm3, %v93_v17  ;;  %v52_v29 = vpop.permute.xlu1 %51 }
  0x8b   :  { %v65_v30 = vsel %vm59_vm5, %v43_v27, %v50_v28  ;;  %v60_v31 = vsel %vm59_vm5, %v50_v28, %v52_v29  ;;  %403 = vmatprep.mubr.f32.mxu0 %v4992_v5 }
  0x8c   :  { %4734 = vmatprep.subr.msk.mxu0 %vm97_vm2, %v60_v31 }
  0x8d   :  { %4735 = vmatpush1.msk.msra.mxu0 %vm97_vm2, %v65_v30 }
  0x8e   :  { %v54_v32 = vpop.permute.xlu0 %53  ;;  %v56_v33 = vpop.permute.xlu1 %55  ;;  %4736 = vmatmul.mubr.msk.f32.vlgmr.msra.gmra.mrb[0].mxu0 %vm94_vm3, %v5101_v6 }
  0x8f   :  { %v61_v34 = vsel %vm59_vm5, %v52_v29, %v54_v32  ;;  %v62_v35 = vsel %vm59_vm5, %v54_v32, %v56_v33  ;;  %474 = vmatprep.mubr.f32.mxu0 %v4992_v5 }
  0x90   :  { %4737 = vmatprep.subr.msk.mxu0 %vm97_vm2, %v62_v35 }
  0x91   :  { %4738 = vmatpush1.msk.msra.mxu0 %vm97_vm2, %v61_v34 }
  0x92   :  { %v58_v36 = vpop.permute.xlu0 %57  ;;  %v553_v37 = vpop.permute.xlu1 %552  ;;  %4739 = vmatmul.mubr.msk.f32.vlgmr.msra.gmra.mrb[2].mxu0 %vm94_vm3, %v5101_v6 }
  0x93   :  { %v63_v38 = vsel %vm59_vm5, %v56_v33, %v58_v36  ;;  %4740 = vmatprep.subr.msk.mxu0 %vm97_vm2, %v58_v36  ;;  %545 = vmatprep.mubr.f32.mxu0 %v4992_v5 }
  0x94   :  { %4741 = vmatpush1.msk.msra.mxu0 %vm97_vm2, %v63_v38 }
  0x96   :  { %v555_v39 = vpop.permute.xlu0 %554  ;;  %v560_v40 = vpop.permute.xlu1 %559  ;;  %4742 = vmatmul.mubr.msk.f32.vlgmr.msra.gmra.mrb[4].mxu0 %vm94_vm3, %v5101_v6 }
  0x97   :  { %659 = vmatprep.mubr.f32.mxu0 %v4992_v5  ;;  %v557_v41 = vsel %vm556_vm6, %v553_v37, %v555_v39 }
  0x98   :  { %v575_v45 = vsel %vm569_vm7, %v557_v41, %v560_v40 }
  0x9a   :  { %v562_v42 = vpop.permute.xlu0 %561  ;;  %v579_v43 = vpop.permute.xlu1 %578 }
  0x9b   :  { %v570_v44 = vsel %vm569_vm7, %v560_v40, %v562_v42 }
  0x9c   :  { %4743 = vmatprep.subr.msk.mxu0 %vm97_vm2, %v570_v44 }
  0x9d   :  { %4744 = vmatpush1.msk.msra.mxu0 %vm97_vm2, %v575_v45 }
  0x9e   :  { %v564_v46 = vpop.permute.xlu0 %563  ;;  %4745 = vmatmul.mubr.msk.f32.vlgmr.msra.gmra.mrb[0].mxu0 %vm94_vm3, %v579_v43  ;;  %v566_v47 = vpop.permute.xlu1 %565 }
  0x9f   :  { %v571_v48 = vsel %vm569_vm7, %v562_v42, %v564_v46  ;;  %v572_v49 = vsel %vm569_vm7, %v564_v46, %v566_v47  ;;  %730 = vmatprep.mubr.f32.mxu0 %v4992_v5 }
  0xa0   :  { %4746 = vmatprep.subr.msk.mxu0 %vm97_vm2, %v572_v49 }
  0xa1   :  { %4747 = vmatpush1.msk.msra.mxu0 %vm97_vm2, %v571_v48 }
  0xa2   :  { %v568_v50 = vpop.permute.xlu0 %567  ;;  %4748 = vmatmul.mubr.msk.f32.vlgmr.msra.gmra.mrb[2].mxu0 %vm94_vm3, %v579_v43  ;;  %v818_v51 = vpop.permute.xlu1 %817 }
  0xa3   :  { %v573_v52 = vsel %vm569_vm7, %v566_v47, %v568_v50  ;;  %4749 = vmatprep.subr.msk.mxu0 %vm97_vm2, %v568_v50  ;;  %801 = vmatprep.mubr.f32.mxu0 %v4992_v5 }
  0xa4   :  { %4750 = vmatpush1.msk.msra.mxu0 %vm97_vm2, %v573_v52 }
  0xa6   :  { %v820_v53 = vpop.permute.xlu0 %819  ;;  %4751 = vmatmul.mubr.msk.f32.vlgmr.msra.gmra.mrb[4].mxu0 %vm94_vm3, %v579_v43  ;;  %v815_v54 = vpop.permute.xlu1 %814 }
  0xa7   :  { %v836_v55 = vsel %vm829_vm8, %v815_v54, %v818_v51  ;;  %v830_v56 = vsel %vm829_vm8, %v818_v51, %v820_v53  ;;  %920 = vmatprep.mubr.f32.mxu0 %v4992_v5 }
  0xa8   :  { %4752 = vmatprep.subr.msk.mxu0 %vm97_vm2, %v830_v56 }
  0xa9   :  { %4753 = vmatpush1.msk.msra.mxu0 %vm97_vm2, %v836_v55 }
  0xaa   :  { %v840_v57 = vpop.permute.xlu0 %839  ;;  %v822_v58 = vpop.permute.xlu1 %821 }
  0xab   :  { %4754 = vmatmul.mubr.msk.f32.vlgmr.msra.gmra.mrb[0].mxu0 %vm94_vm3, %v840_v57  ;;  %v831_v62 = vsel %vm829_vm8, %v820_v53, %v822_v58 }
  0xac   :  { %991 = vmatprep.mubr.f32.mxu0 %v4992_v5 }
  0xae   :  { %v824_v59 = vpop.permute.xlu0 %823  ;;  %v826_v60 = vpop.permute.xlu1 %825 }
  0xaf   :  { %v832_v61 = vsel %vm829_vm8, %v822_v58, %v824_v59  ;;  %v833_v9 = vsel %vm829_vm8, %v824_v59, %v826_v60 }
  0xb0   :  { %4755 = vmatprep.subr.msk.mxu0 %vm97_vm2, %v832_v61  ;;  %v2377_v61 = vlaneseq }
  0xb1   :  { %4756 = vmatpush1.msk.msra.mxu0 %vm97_vm2, %v831_v62 }
  0xb2   :  { %v828_v63 = vpop.permute.xlu0 %827  ;;  %4757 = vmatmul.mubr.msk.f32.vlgmr.msra.gmra.mrb[2].mxu0 %vm94_vm3, %v840_v57  ;;  %v1076_v0 = vpop.permute.xlu1 %1075  ;;  %v5402_v62 = vshrl.u32 %v2377_v61, 7 }
  0xb3   :  { %v834_v6 = vsel %vm829_vm8, %v826_v60, %v828_v63  ;;  %1062 = vmatprep.mubr.f32.mxu0 %v4992_v5  ;;  %v5398_v60 = vld [vmem:[%s5710_s4] sm:$0xff]  ;;  %s5017_s4 = smov 80  }
  0xb4   :  { %4758 = vmatprep.subr.msk.mxu0 %vm97_vm2, %v834_v6  ;;  %2475 = vrot.lane.b32.xlu0 %v5398_v60, %s4998_s19  ;;  %v2379_v63 = vsub.s32 0, %v5402_v62  ;;  %v32_v6 = vld [vmem:[%s5707_s1] sm:$0x3f]  ;;  %s5016_s1 = smov 88   ;;  %s5021_s19 = smov [#allocation3]  }
  0xb5   :  { %4759 = vmatpush1.msk.msra.mxu0 %vm97_vm2, %v833_v9  ;;  %v2383_v9 = vsub.s32 1, %v5402_v62 }
  0xb6   :  { %v1313_v10 = vpop.permute.xlu0 %1312  ;;  %4760 = vmatmul.mubr.msk.f32.vlgmr.msra.gmra.mrb[4].mxu0 %vm94_vm3, %v840_v57  ;;  %v1315_v11 = vpop.permute.xlu1 %1314  ;;  %4761 = vmatprep.subr.msk.mxu0 %vm97_vm2, %v5090_v4 }
  0xb7   :  { %4762 = vmatpush1.msk.msra.mxu0 %vm97_vm2, %v5078_v2  ;;  %1155 = vmatprep.mubr.f32.mxu0 %v4992_v5 }
  0xb8   :  { %4764 = vmatprep.subr.msk.mxu0 %vm97_vm2, %v5113_v8  ;;  %v1324_v8 = vsel %vm1322_vm9, %v1313_v10, %v1315_v11 }
  0xba   :  { %v1311_v12 = vpop.permute.xlu0 %1310  ;;  %4763 = vmatmul.mubr.msk.f32.vlgmr.msra.gmra.mrb[0].mxu0 %vm94_vm3, %v1076_v0  ;;  %v1337_v13 = vpop.permute.xlu1 %1336 }
  0xbb   :  { %4765 = vmatpush1.msk.msra.mxu0 %vm97_vm2, %v5106_v7  ;;  %1226 = vmatprep.mubr.f32.mxu0 %v4992_v5  ;;  %v1323_v7 = vsel %vm1322_vm9, %v1311_v12, %v1313_v10  ;;  %v5411_v12 = vrot.slane %v32_v6, %v2379_v63 }
  0xbc   :  { %4767 = vmatprep.subr.msk.mxu0 %vm97_vm2, %v5086_v3 }
  0xbe   :  { %v1317_v4 = vpop.permute.xlu0 %1316  ;;  %4766 = vmatmul.mubr.msk.f32.vlgmr.msra.gmra.mrb[2].mxu0 %vm94_vm3, %v1076_v0  ;;  %v1319_v2 = vpop.permute.xlu1 %1318 }
  0xbf   :  { %4768 = vmatpush1.msk.msra.mxu0 %vm97_vm2, %v5073_v1  ;;  %1297 = vmatprep.mubr.f32.mxu0 %v4992_v5  ;;  %v1326_v3 = vsel %vm1322_vm9, %v1317_v4, %v1319_v2  ;;  %v1325_v1 = vsel %vm1322_vm9, %v1315_v11, %v1317_v4 }
  0xc0   :  { %4770 = vmatprep.subr.msk.mxu0 %vm97_vm2, %v1324_v8 }
  0xc2   :  { %v1321_v14 = vpop.permute.xlu0 %1320  ;;  %4769 = vmatmul.mubr.msk.f32.vlgmr.msra.gmra.mrb[4].mxu0 %vm94_vm3, %v1076_v0  ;;  %v1330_v15 = vpop.permute.xlu1 %1329 }
  0xc3   :  { %4771 = vmatpush1.msk.msra.mxu0 %vm97_vm2, %v1323_v7  ;;  %1417 = vmatprep.mubr.f32.mxu0 %v4992_v5  ;;  %v1333_v18 = vsel %vm1332_vm10, %v1321_v14, %v1330_v15  ;;  %v1327_v19 = vsel %vm1322_vm9, %v1319_v2, %v1321_v14  ;;  %v5413_v2 = vrot.slane %v32_v6, %v2383_v9 }
  0xc4   :  { %4773 = vmatprep.subr.msk.mxu0 %vm97_vm2, %v1326_v3  ;;  %v2387_v3 = vsub.s32 2, %v5402_v62 }
  0xc6   :  { %v1575_v16 = vpop.permute.xlu0 %1574  ;;  %4772 = vmatmul.mubr.msk.f32.vlgmr.msra.gmra.mrb[0].mxu0 %vm94_vm3, %v1337_v13  ;;  %v1577_v17 = vpop.permute.xlu1 %1576 }
  0xc7   :  { %4774 = vmatpush1.msk.msra.mxu0 %vm97_vm2, %v1325_v1  ;;  %1488 = vmatprep.mubr.f32.mxu0 %v4992_v5  ;;  %v1586_v22 = vsel %vm1584_vm11, %v1575_v16, %v1577_v17 }
  0xc8   :  { %4776 = vmatprep.subr.msk.mxu0 %vm97_vm2, %v1333_v18  ;;  %v2391_v18 = vsub.s32 3, %v5402_v62 }
  0xca   :  { %v1573_v20 = vpop.permute.xlu0 %1572  ;;  %4775 = vmatmul.mubr.msk.f32.vlgmr.msra.gmra.mrb[2].mxu0 %vm94_vm3, %v1337_v13  ;;  %v1599_v21 = vpop.permute.xlu1 %1598 }
  0xcb   :  { %4777 = vmatpush1.msk.msra.mxu0 %vm97_vm2, %v1327_v19  ;;  %1559 = vmatprep.mubr.f32.mxu0 %v4992_v5  ;;  %v1585_v23 = vsel %vm1584_vm11, %v1573_v20, %v1575_v16  ;;  %v5427_v20 = vrot.slane %v32_v6, %v2387_v3 }
  0xcc   :  { %4779 = vmatprep.subr.msk.mxu0 %vm97_vm2, %v1586_v22 }
  0xce   :  { %v1579_v24 = vpop.permute.xlu0 %1578  ;;  %4778 = vmatmul.mubr.msk.f32.vlgmr.msra.gmra.mrb[4].mxu0 %vm94_vm3, %v1337_v13  ;;  %v1581_v25 = vpop.permute.xlu1 %1580 }
  0xcf   :  { %4780 = vmatpush1.msk.msra.mxu0 %vm97_vm2, %v1585_v23  ;;  %v1588_v26 = vsel %vm1584_vm11, %v1579_v24, %v1581_v25  ;;  %1679 = vmatprep.mubr.f32.mxu0 %v4992_v5  ;;  %v1587_v27 = vsel %vm1584_vm11, %v1577_v17, %v1579_v24  ;;  %v5431_v24 = vrot.slane %v32_v6, %v2391_v18 }
  0xd0   :  { %4782 = vmatprep.subr.msk.mxu0 %vm97_vm2, %v1588_v26 }
  0xd2   :  { %v1583_v28 = vpop.permute.xlu0 %1582  ;;  %4781 = vmatmul.mubr.msk.f32.vlgmr.msra.gmra.mrb[0].mxu0 %vm94_vm3, %v1599_v21  ;;  %v1592_v29 = vpop.permute.xlu1 %1591 }
  0xd3   :  { %v1589_v30 = vsel %vm1584_vm11, %v1581_v25, %v1583_v28  ;;  %4783 = vmatpush1.msk.msra.mxu0 %vm97_vm2, %v1587_v27  ;;  %1750 = vmatprep.mubr.f32.mxu0 %v4992_v5  ;;  %v2395_v28 = vsub.s32 4, %v5402_v62 }
  0xd4   :  { %v1595_v31 = vsel %vm1594_vm12, %v1589_v30, %v1592_v29  ;;  %4785 = vmatprep.subr.msk.mxu0 %vm97_vm2, %v1592_v29 }
  0xd6   :  { %v1837_v32 = vpop.permute.xlu0 %1836  ;;  %4784 = vmatmul.mubr.msk.f32.vlgmr.msra.gmra.mrb[2].mxu0 %vm94_vm3, %v1599_v21  ;;  %v1839_v33 = vpop.permute.xlu1 %1838 }
  0xd7   :  { %4786 = vmatpush1.msk.msra.mxu0 %vm97_vm2, %v1595_v31  ;;  %v1848_v34 = vsel %vm1846_vm13, %v1837_v32, %v1839_v33  ;;  %1821 = vmatprep.mubr.f32.mxu0 %v4992_v5  ;;  %v5446_v31 = vrot.slane %v32_v6, %v2395_v28 }
  0xd8   :  { %4788 = vmatprep.subr.msk.mxu0 %vm97_vm2, %v1848_v34  ;;  %v2399_v34 = vsub.s32 5, %v5402_v62 }
  0xda   :  { %v1835_v35 = vpop.permute.xlu0 %1834  ;;  %4787 = vmatmul.mubr.msk.f32.vlgmr.msra.gmra.mrb[4].mxu0 %vm94_vm3, %v1599_v21  ;;  %v1861_v36 = vpop.permute.xlu1 %1860 }
  0xdb   :  { %v1847_v37 = vsel %vm1846_vm13, %v1835_v35, %v1837_v32  ;;  %1941 = vmatprep.mubr.f32.mxu0 %v4992_v5 }
  0xdc   :  { %4789 = vmatpush1.msk.msra.mxu0 %vm97_vm2, %v1847_v37 }
  0xde   :  { %v1841_v38 = vpop.permute.xlu0 %1840  ;;  %4790 = vmatmul.mubr.msk.f32.vlgmr.msra.gmra.mrb[0].mxu0 %vm94_vm3, %v1861_v36  ;;  %v1843_v39 = vpop.permute.xlu1 %1842 }
  0xdf   :  { %v1849_v40 = vsel %vm1846_vm13, %v1839_v33, %v1841_v38  ;;  %v1850_v41 = vsel %vm1846_vm13, %v1841_v38, %v1843_v39  ;;  %2012 = vmatprep.mubr.f32.mxu0 %v4992_v5 }
  0xe0   :  { %4791 = vmatprep.subr.msk.mxu0 %vm97_vm2, %v1850_v41 }
  0xe1   :  { %4792 = vmatpush1.msk.msra.mxu0 %vm97_vm2, %v1849_v40 }
  0xe2   :  { %v1845_v42 = vpop.permute.xlu0 %1844  ;;  %4793 = vmatmul.mubr.msk.f32.vlgmr.msra.gmra.mrb[2].mxu0 %vm94_vm3, %v1861_v36  ;;  %v1854_v43 = vpop.permute.xlu1 %1853 }
  0xe3   :  { %v1851_v44 = vsel %vm1846_vm13, %v1843_v39, %v1845_v42  ;;  %4794 = vmatprep.subr.msk.mxu0 %vm97_vm2, %v1854_v43  ;;  %2083 = vmatprep.mubr.f32.mxu0 %v4992_v5  ;;  %v4628_v42 = vld [vmem:[%s5711_s5] sm:$0xff]  ;;  %s5020_s5 = smov 60  }
  0xe4   :  { %v1857_v45 = vsel %vm5715_vm14, %v1851_v44, %v1854_v43  ;;  %vm2118_vm14 = vcmask 957440  }
  0xe5   :  { %4795 = vmatpush1.msk.msra.mxu0 %vm97_vm2, %v1857_v45 }
  0xe6   :  { %v2099_v46 = vpop.permute.xlu0 %2098  ;;  %4796 = vmatmul.mubr.msk.f32.vlgmr.msra.gmra.mrb[4].mxu0 %vm94_vm3, %v1861_v36  ;;  %v2101_v47 = vpop.permute.xlu1 %2100  ;;  %v5460_v36 = vrot.slane %v32_v6, %v2399_v34 }
  0xe7   :  { %v2110_v48 = vsel %vm2108_vm15, %v2099_v46, %v2101_v47  ;;  %2203 = vmatprep.mubr.f32.mxu0 %v4992_v5 }
  0xe8   :  { %4797 = vmatprep.subr.msk.mxu0 %vm97_vm2, %v2110_v48 }
  0xea   :  { %v2097_v49 = vpop.permute.xlu0 %2096  ;;  %v2123_v50 = vpop.permute.xlu1 %2122 }
  0xeb   :  { %v2109_v51 = vsel %vm2108_vm15, %v2097_v49, %v2099_v46 }
  0xec   :  { %4798 = vmatpush1.msk.msra.mxu0 %vm97_vm2, %v2109_v51 }
  0xed   :  { %4799 = vmatmul.mubr.msk.f32.vlgmr.msra.gmra.mrb[0].mxu0 %vm94_vm3, %v2123_v50 }
  0xee   :  { %v2103_v52 = vpop.permute.xlu0 %2102  ;;  %v2105_v53 = vpop.permute.xlu1 %2104  ;;  %2274 = vmatprep.mubr.f32.mxu0 %v4992_v5 }
  0xef   :  { %v2111_v54 = vsel %vm2108_vm15, %v2101_v47, %v2103_v52  ;;  %v2112_v55 = vsel %vm2108_vm15, %v2103_v52, %v2105_v53 }
  0xf0   :  { %4800 = vmatprep.subr.msk.mxu0 %vm97_vm2, %v2112_v55 }
  0xf1   :  { %4801 = vmatpush1.msk.msra.mxu0 %vm97_vm2, %v2111_v54 }
  0xf2   :  { %v2107_v56 = vpop.permute.xlu0 %2106  ;;  %4802 = vmatmul.mubr.msk.f32.vlgmr.msra.gmra.mrb[2].mxu0 %vm94_vm3, %v2123_v50  ;;  %v2116_v57 = vpop.permute.xlu1 %2115 }
  0xf3   :  { %v2113_v58 = vsel %vm2108_vm15, %v2105_v53, %v2107_v56  ;;  %4803 = vmatprep.subr.msk.mxu0 %vm97_vm2, %v2116_v57  ;;  %2345 = vmatprep.mubr.f32.mxu0 %v4992_v5 }
  0xf4   :  { %v2119_v59 = vsel %vm2118_vm14, %v2113_v58, %v2116_v57 }
  0xf5   :  { %4804 = vmatpush1.msk.msra.mxu0 %vm97_vm2, %v2119_v59  ;;  %vm2477_vm2 = vcmask 64512  }
  0xf6   :  { %4805 = vmatmul.mubr.msk.f32.vlgmr.msra.gmra.mrb[4].mxu0 %vm94_vm3, %v2123_v50  ;;  %vm4670_vm3 = vcmask 490496  }
 0x103   :  { %v2362_v0 = vpop.permute.xlu0 %2361 }
 0x126   :  { %v2476_v38 = vpop.permute.xlu0 %2475 }
 0x1c0   :  { %v2205_v10 = vpop.f32.mrb[0].mxu0 }
 0x1c1   :  { %v2364_v11 = vadd.f32 %v2362_v0, %v2205_v10  ;;  %v2207_v13 = vpop.f32.mrb[1].mxu0 }
 0x1c2   :  { %v2365_v4 = vadd.f32 %v2362_v0, %v2207_v13 }
 0x1c3   :  { %v2370_v8 = vmax.f32 %v2364_v11, 0.0 }
 0x1c4   :  { %v2371_v7 = vmax.f32 %v2365_v4, 0.0 }
 0x1c5   :  { %v5416_v14 = vmul.f32 %v5411_v12, %v2370_v8  ;;  %v2276_v15 = vpop.f32.mrb[2].mxu0 }
 0x1c6   :  { %v5420_v1 = vmul.f32 %v5413_v2, %v2371_v7  ;;  %v2366_v16 = vadd.f32 %v2362_v0, %v2276_v15  ;;  %v2278_v17 = vpop.f32.mrb[3].mxu0 }
 0x1c7   :  { %2453 = vrot.lane.b32.xlu0 %v5416_v14, %s4991_s12  ;;  %v2367_v21 = vadd.f32 %v2362_v0, %v2278_v17 }
 0x1c8   :  { %2455 = vrot.lane.b32.xlu1 %v5420_v1, %s4991_s12  ;;  %v2372_v19 = vmax.f32 %v2366_v16, 0.0 }
 0x1c9   :  { %v2347_v22 = vpop.f32.mrb[4].mxu0  ;;  %v2373_v26 = vmax.f32 %v2367_v21, 0.0 }
 0x1ca   :  { %v2349_v23 = vpop.f32.mrb[5].mxu0  ;;  %v5436_v25 = vmul.f32 %v5427_v20, %v2372_v19  ;;  %v2368_v27 = vadd.f32 %v2362_v0, %v2347_v22 }
 0x1cb   :  { %2425 = vrot.lane.b32.xlu0 %v5416_v14, %s4995_s0  ;;  %v5444_v29 = vmul.f32 %v5431_v24, %v2373_v26  ;;  %v2369_v33 = vadd.f32 %v2362_v0, %v2349_v23 }
 0x1cc   :  { %2427 = vrot.lane.b32.xlu1 %v5420_v1, %s4995_s0  ;;  %v2374_v30 = vmax.f32 %v2368_v27, 0.0 }
 0x1cd   :  { %v2375_v35 = vmax.f32 %v2369_v33, 0.0 }
 0x1ce   :  { %v5453_v32 = vmul.f32 %v5446_v31, %v2374_v30 }
 0x1cf   :  { %2429 = vrot.lane.b32.xlu0 %v5436_v25, %s4995_s0  ;;  %v5467_v37 = vmul.f32 %v5460_v36, %v2375_v35 }
 0x1d0   :  { %2457 = vrot.lane.b32.xlu1 %v5436_v25, %s4991_s12 }
 0x1d3   :  { %2459 = vrot.lane.b32.xlu0 %v5444_v29, %s4991_s12 }
 0x1d4   :  { %2431 = vrot.lane.b32.xlu1 %v5444_v29, %s4995_s0 }
 0x1d7   :  { %2415 = vrot.lane.b32.xlu0 %v5453_v32, %s4994_s2 }
 0x1d8   :  { %2447 = vrot.lane.b32.xlu1 %v5453_v32, %s4990_s11 }
 0x1db   :  { %2433 = vrot.lane.b32.xlu0 %v5453_v32, %s4995_s0  ;;  %s5019_s0 = smov 64  }
 0x1dc   :  { %2461 = vrot.lane.b32.xlu1 %v5453_v32, %s4991_s12 }
 0x1df   :  { %2916 = vrot.lane.b32.xlu0 %v5420_v1, %s4997_s18 }
 0x1e0   :  { %2449 = vrot.lane.b32.xlu1 %v5467_v37, %s4990_s11  ;;  %s5018_s11 = smov 72  }
 0x1e3   :  { %2918 = vrot.lane.b32.xlu0 %v5436_v25, %s4997_s18 }
 0x1e4   :  { %2908 = vrot.lane.b32.xlu1 %v5453_v32, %s4996_s17 }
 0x1e7   :  { %2922 = vrot.lane.b32.xlu0 %v5453_v32, %s4997_s18 }
 0x1e8   :  { %2914 = vrot.lane.b32.xlu1 %v5416_v14, %s4997_s18 }
 0x1eb   :  { %2910 = vrot.lane.b32.xlu0 %v5467_v37, %s4996_s17 }
 0x1ec   :  { %2417 = vrot.lane.b32.xlu1 %v5467_v37, %s4994_s2 }
 0x1ef   :  { %3163 = vrot.lane.b32.xlu0 %v5420_v1, %s4999_s20 }
 0x1f0   :  { %2935 = vrot.lane.b32.xlu1 %v5398_v60, %s5002_s23 }
 0x1f3   :  { %3185 = vrot.lane.b32.xlu0 %v5398_v60, %s5007_s28 }
 0x1f4   :  { %2920 = vrot.lane.b32.xlu1 %v5444_v29, %s4997_s18 }
 0x1f7   :  { %3167 = vrot.lane.b32.xlu0 %v5444_v29, %s4999_s20 }
 0x1f8   :  { %3161 = vrot.lane.b32.xlu1 %v5416_v14, %s4999_s20 }
 0x1fb   :  { %3633 = vrot.lane.b32.xlu0 %v5420_v1, %s5003_s24 }
 0x1fc   :  { %3165 = vrot.lane.b32.xlu1 %v5436_v25, %s4999_s20 }
 0x1ff   :  { %3171 = vrot.lane.b32.xlu0 %v5467_v37, %s4999_s20 }
 0x200   :  { %3169 = vrot.lane.b32.xlu1 %v5453_v32, %s4999_s20 }
 0x203   :  { %3631 = vrot.lane.b32.xlu0 %v5416_v14, %s5003_s24 }
 0x204   :  { %3158 = vrot.lane.b32.xlu1 %v5467_v37, %s5000_s21 }
 0x207   :  { %3637 = vrot.lane.b32.xlu0 %v5444_v29, %s5003_s24 }
 0x208   :  { %3408 = vrot.lane.b32.xlu1 %v5398_v60, %s5014_s13 }
 0x20b   :  { %3883 = vrot.lane.b32.xlu0 %v5420_v1, %s5006_s27 }
 0x20c   :  { %3635 = vrot.lane.b32.xlu1 %v5436_v25, %s5003_s24 }
 0x20f   :  { %3881 = vrot.lane.b32.xlu0 %v5416_v14, %s5006_s27 }
 0x210   :  { %3658 = vrot.lane.b32.xlu1 %v5398_v60, %s5016_s1 }
 0x213   :  { %3887 = vrot.lane.b32.xlu0 %v5444_v29, %s5006_s27 }
 0x214   :  { %3639 = vrot.lane.b32.xlu1 %v5453_v32, %s5003_s24 }
 0x217   :  { %3641 = vrot.lane.b32.xlu0 %v5467_v37, %s5003_s24 }
 0x218   :  { %3654 = vrot.lane.b32.xlu1 %v5416_v14, %s5005_s26 }
 0x21b   :  { %4132 = vrot.lane.b32.xlu0 %v5420_v1, %s5009_s30 }
 0x21c   :  { %3885 = vrot.lane.b32.xlu1 %v5436_v25, %s5006_s27 }
 0x21f   :  { %4130 = vrot.lane.b32.xlu0 %v5416_v14, %s5009_s30 }
 0x220   :  { %3907 = vrot.lane.b32.xlu1 %v5398_v60, %s5017_s4 }
 0x223   :  { %3891 = vrot.lane.b32.xlu0 %v5467_v37, %s5006_s27 }
 0x224   :  { %3889 = vrot.lane.b32.xlu1 %v5453_v32, %s5006_s27 }
 0x227   :  { %4136 = vrot.lane.b32.xlu0 %v5444_v29, %s5009_s30 }
 0x228   :  { %3903 = vrot.lane.b32.xlu1 %v5416_v14, %s5008_s29 }
 0x22b   :  { %4381 = vrot.lane.b32.xlu0 %v5420_v1, %s5012_s7 }
 0x22c   :  { %4134 = vrot.lane.b32.xlu1 %v5436_v25, %s5009_s30 }
 0x22f   :  { %4140 = vrot.lane.b32.xlu0 %v5467_v37, %s5009_s30 }
 0x230   :  { %4156 = vrot.lane.b32.xlu1 %v5398_v60, %s5018_s11 }
 0x233   :  { %4379 = vrot.lane.b32.xlu0 %v5416_v14, %s5012_s7 }
 0x234   :  { %4138 = vrot.lane.b32.xlu1 %v5453_v32, %s5009_s30 }
 0x237   :  { %4385 = vrot.lane.b32.xlu0 %v5444_v29, %s5012_s7 }
 0x238   :  { %4152 = vrot.lane.b32.xlu1 %v5416_v14, %s5011_s10 }
 0x239   :  { %v2454_v39 = vpop.permute.xlu0 %2453 }
 0x23a   :  { %v2456_v40 = vpop.permute.xlu1 %2455 }
 0x23b   :  { %4389 = vrot.lane.b32.xlu0 %v5467_v37, %s5012_s7  ;;  %v2463_v41 = vsel %vm84_vm1, %v2454_v39, %v2456_v40 }
 0x23c   :  { %4383 = vrot.lane.b32.xlu1 %v5436_v25, %s5012_s7  ;;  %2480 = vmatprep.subr.mxu1 %v2463_v41 }
 0x23d   :  { %v2426_v43 = vpop.permute.xlu0 %2425 }
 0x23e   :  { %v2428_v44 = vpop.permute.xlu1 %2427 }
 0x23f   :  { %4631 = vperm.xlu0 %4961, %v4628_v42   ;;  %v2435_v10 = vsel %vm59_vm5, %v2426_v43, %v2428_v44 }
 0x240   :  { %4405 = vrot.lane.b32.xlu1 %v5398_v60, %s5019_s0 }
 0x241   :  { %v2430_v45 = vpop.permute.xlu0 %2429 }
 0x242   :  { %v2458_v46 = vpop.permute.xlu1 %2457  ;;  %v2436_v3 = vsel %vm59_vm5, %v2428_v44, %v2430_v45 }
 0x243   :  { %v2464_v59 = vsel %vm84_vm1, %v2456_v40, %v2458_v46 }
 0x244   :  { %4387 = vrot.lane.b32.xlu1 %v5453_v32, %s5012_s7 }
 0x245   :  { %v2460_v47 = vpop.permute.xlu0 %2459 }
 0x246   :  { %v2432_v48 = vpop.permute.xlu1 %2431  ;;  %v2465_v58 = vsel %vm84_vm1, %v2458_v46, %v2460_v47 }
 0x247   :  { %v2437_v15 = vsel %vm59_vm5, %v2430_v45, %v2432_v48 }
 0x248   :  { %4401 = vrot.lane.b32.xlu1 %v5416_v14, %s5015_s14 }
 0x249   :  { %v2416_v49 = vpop.permute.xlu0 %2415 }
 0x24a   :  { %v2448_v50 = vpop.permute.xlu1 %2447 }
 0x24d   :  { %v2434_v51 = vpop.permute.xlu0 %2433 }
 0x24e   :  { %v2462_v52 = vpop.permute.xlu1 %2461  ;;  %v2438_v18 = vsel %vm59_vm5, %v2432_v48, %v2434_v51 }
 0x24f   :  { %v2466_v6 = vsel %vm84_vm1, %v2460_v47, %v2462_v52 }
 0x251   :  { %v2917_v53 = vpop.permute.xlu0 %2916 }
 0x252   :  { %v2450_v54 = vpop.permute.xlu1 %2449 }
 0x253   :  { %v2451_v55 = vsel %vm71_vm0, %v2448_v50, %v2450_v54  ;;  %vm5716_vm0 = vcmask 965632  }
 0x254   :  { %v2473_v56 = vsel %vm84_vm1, %v2451_v55, %v2454_v39  ;;  %vm4653_vm1 = vcmask 556032  }
 0x255   :  { %2481 = vmatpush1.msra.mxu1 %v2473_v56  ;;  %v2919_v57 = vpop.permute.xlu0 %2918 }
 0x256   :  { %v2909_v61 = vpop.permute.xlu1 %2908  ;;  %4806 = vmatmul.mubr.msk.f32.vlgmr.msra.gmra.mrb[0].mxu1 %vm2477_vm2, %v2476_v38  ;;  %2551 = vmatprep.subr.mxu1 %v2465_v58  ;;  %v2925_v33 = vsel %vm569_vm7, %v2917_v53, %v2919_v57 }
 0x257   :  { %2552 = vmatpush1.msra.mxu1 %v2464_v59  ;;  %2615 = vmatprep.mubr.f32.mxu1 %v4992_v5 }
 0x258   :  { %2622 = vmatprep.subr.mxu1 %v2462_v52 }
 0x259   :  { %v2923_v0 = vpop.permute.xlu0 %2922 }
 0x25a   :  { %v2915_v9 = vpop.permute.xlu1 %2914  ;;  %4807 = vmatmul.mubr.msk.f32.vlgmr.msra.gmra.mrb[2].mxu1 %vm2477_vm2, %v2476_v38 }
 0x25b   :  { %2623 = vmatpush1.msra.mxu1 %v2466_v6  ;;  %2686 = vmatprep.mubr.f32.mxu1 %v4992_v5  ;;  %v2924_v22 = vsel %vm569_vm7, %v2915_v9, %v2917_v53 }
 0x25c   :  { %2695 = vmatprep.subr.mxu1 %v2435_v10 }
 0x25d   :  { %v2911_v11 = vpop.permute.xlu0 %2910 }
 0x25e   :  { %v2418_v13 = vpop.permute.xlu1 %2417  ;;  %4808 = vmatmul.mubr.msk.f32.vlgmr.msra.gmra.mrb[4].mxu1 %vm2477_vm2, %v2476_v38  ;;  %v2912_v21 = vsel %vm556_vm6, %v2909_v61, %v2911_v11 }
 0x25f   :  { %v2419_v4 = vsel %vm42_vm4, %v2416_v49, %v2418_v13  ;;  %2759 = vmatprep.mubr.f32.mxu1 %v4992_v5  ;;  %v2934_v27 = vsel %vm569_vm7, %v2912_v21, %v2915_v9  ;;  %vm4690_vm4 = vcmask 15360  }
 0x260   :  { %v2445_v8 = vsel %vm59_vm5, %v2419_v4, %v2426_v43  ;;  %vm4709_vm5 = vcmask 8192  }
 0x261   :  { %2696 = vmatpush1.msra.mxu1 %v2445_v8  ;;  %v3164_v7 = vpop.permute.xlu0 %3163 }
 0x262   :  { %v2936_v16 = vpop.permute.xlu1 %2935  ;;  %4809 = vmatmul.mubr.msk.f32.vlgmr.msra.gmra.mrb[0].mxu1 %vm2477_vm2, %v5398_v60  ;;  %2766 = vmatprep.subr.mxu1 %v2437_v15 }
 0x263   :  { %2767 = vmatpush1.msra.mxu1 %v2436_v3  ;;  %2830 = vmatprep.mubr.f32.mxu1 %v4992_v5 }
 0x264   :  { %2837 = vmatprep.subr.mxu1 %v2434_v51 }
 0x265   :  { %v3186_v17 = vpop.permute.xlu0 %3185 }
 0x266   :  { %v2921_v19 = vpop.permute.xlu1 %2920  ;;  %4810 = vmatmul.mubr.msk.f32.vlgmr.msra.gmra.mrb[2].mxu1 %vm2477_vm2, %v5398_v60 }
 0x267   :  { %2838 = vmatpush1.msra.mxu1 %v2438_v18  ;;  %2901 = vmatprep.mubr.f32.mxu1 %v4992_v5  ;;  %v2926_v28 = vsel %vm569_vm7, %v2919_v57, %v2921_v19 }
 0x268   :  { %2939 = vmatprep.subr.mxu1 %v2924_v22 }
 0x269   :  { %v3168_v23 = vpop.permute.xlu0 %3167 }
 0x26a   :  { %v3162_v26 = vpop.permute.xlu1 %3161  ;;  %4811 = vmatmul.mubr.msk.f32.vlgmr.msra.gmra.mrb[4].mxu1 %vm2477_vm2, %v5398_v60  ;;  %v2927_v60 = vsel %vm569_vm7, %v2921_v19, %v2923_v0 }
 0x26b   :  { %2940 = vmatpush1.msra.mxu1 %v2934_v27  ;;  %3003 = vmatprep.mubr.f32.mxu1 %v4992_v5  ;;  %v3173_v39 = vsel %vm829_vm8, %v3162_v26, %v3164_v7 }
 0x26c   :  { %3010 = vmatprep.subr.mxu1 %v2926_v28 }
 0x26d   :  { %v3634_v30 = vpop.permute.xlu0 %3633 }
 0x26e   :  { %v3166_v34 = vpop.permute.xlu1 %3165  ;;  %4812 = vmatmul.mubr.msk.f32.vlgmr.msra.gmra.mrb[0].mxu1 %vm2477_vm2, %v2936_v16 }
 0x26f   :  { %3011 = vmatpush1.msra.mxu1 %v2925_v33  ;;  %3074 = vmatprep.mubr.f32.mxu1 %v4992_v5  ;;  %v3175_v43 = vsel %vm829_vm8, %v3166_v34, %v3168_v23  ;;  %v3174_v45 = vsel %vm829_vm8, %v3164_v7, %v3166_v34 }
 0x270   :  { %3081 = vmatprep.subr.mxu1 %v2923_v0 }
 0x271   :  { %v3172_v35 = vpop.permute.xlu0 %3171 }
 0x272   :  { %v3170_v38 = vpop.permute.xlu1 %3169  ;;  %4813 = vmatmul.mubr.msk.f32.vlgmr.msra.gmra.mrb[2].mxu1 %vm2477_vm2, %v2936_v16 }
 0x273   :  { %3082 = vmatpush1.msra.mxu1 %v2927_v60  ;;  %3145 = vmatprep.mubr.f32.mxu1 %v4992_v5  ;;  %v3177_v47 = vsel %vm829_vm8, %v3170_v38, %v3172_v35  ;;  %v3176_v49 = vsel %vm829_vm8, %v3168_v23, %v3170_v38 }
 0x274   :  { %3189 = vmatprep.subr.mxu1 %v3173_v39 }
 0x275   :  { %v3632_v40 = vpop.permute.xlu0 %3631 }
 0x276   :  { %v3159_v41 = vpop.permute.xlu1 %3158  ;;  %4814 = vmatmul.mubr.msk.f32.vlgmr.msra.gmra.mrb[4].mxu1 %vm2477_vm2, %v2936_v16  ;;  %v3643_v56 = vsel %vm1322_vm9, %v3632_v40, %v3634_v30 }
 0x277   :  { %v3184_v42 = vsel %vm829_vm8, %v3159_v41, %v3162_v26  ;;  %3253 = vmatprep.mubr.f32.mxu1 %v4992_v5 }
 0x278   :  { %3190 = vmatpush1.msra.mxu1 %v3184_v42 }
 0x279   :  { %3260 = vmatprep.subr.mxu1 %v3175_v43  ;;  %v3638_v44 = vpop.permute.xlu0 %3637 }
 0x27a   :  { %v3409_v46 = vpop.permute.xlu1 %3408  ;;  %4815 = vmatmul.mubr.msk.f32.vlgmr.msra.gmra.mrb[0].mxu1 %vm2477_vm2, %v3186_v17 }
 0x27b   :  { %3261 = vmatpush1.msra.mxu1 %v3174_v45  ;;  %3324 = vmatprep.mubr.f32.mxu1 %v4992_v5 }
 0x27c   :  { %3331 = vmatprep.subr.mxu1 %v3177_v47 }
 0x27d   :  { %v3884_v48 = vpop.permute.xlu0 %3883 }
 0x27e   :  { %v3636_v50 = vpop.permute.xlu1 %3635  ;;  %4816 = vmatmul.mubr.msk.f32.vlgmr.msra.gmra.mrb[2].mxu1 %vm2477_vm2, %v3186_v17 }
 0x27f   :  { %3332 = vmatpush1.msra.mxu1 %v3176_v49  ;;  %3395 = vmatprep.mubr.f32.mxu1 %v4992_v5 }
 0x280   :  { %3412 = vmatprep.subr.mxu1 %v5420_v1 }
 0x281   :  { %v3882_v51 = vpop.permute.xlu0 %3881 }
 0x282   :  { %v3659_v52 = vpop.permute.xlu1 %3658  ;;  %4817 = vmatmul.mubr.msk.f32.vlgmr.msra.gmra.mrb[4].mxu1 %vm2477_vm2, %v3186_v17  ;;  %v3893_v10 = vsel %vm1584_vm11, %v3882_v51, %v3884_v48 }
 0x283   :  { %3413 = vmatpush1.msra.mxu1 %v5416_v14  ;;  %3476 = vmatprep.mubr.f32.mxu1 %v4992_v5  ;;  %v3644_v14 = vsel %vm1322_vm9, %v3634_v30, %v3636_v50 }
 0x284   :  { %3483 = vmatprep.subr.mxu1 %v5444_v29 }
 0x285   :  { %v3888_v53 = vpop.permute.xlu0 %3887 }
 0x286   :  { %v3640_v54 = vpop.permute.xlu1 %3639  ;;  %4818 = vmatmul.mubr.msk.f32.vlgmr.msra.gmra.mrb[0].mxu1 %vm2477_vm2, %v3409_v46 }
 0x287   :  { %3484 = vmatpush1.msra.mxu1 %v5436_v25  ;;  %3547 = vmatprep.mubr.f32.mxu1 %v4992_v5  ;;  %v3646_v25 = vsel %vm1322_vm9, %v3638_v44, %v3640_v54 }
 0x288   :  { %3554 = vmatprep.subr.mxu1 %v5467_v37 }
 0x289   :  { %v3642_v1 = vpop.permute.xlu0 %3641 }
 0x28a   :  { %v3655_v55 = vpop.permute.xlu1 %3654  ;;  %4819 = vmatmul.mubr.msk.f32.vlgmr.msra.gmra.mrb[2].mxu1 %vm2477_vm2, %v3409_v46  ;;  %v3647_v0 = vsel %vm1322_vm9, %v3640_v54, %v3642_v1 }
 0x28b   :  { %3555 = vmatpush1.msra.mxu1 %v5453_v32  ;;  %3618 = vmatprep.mubr.f32.mxu1 %v4992_v5  ;;  %v3645_v32 = vsel %vm1322_vm9, %v3636_v50, %v3638_v44  ;;  %v3657_v59 = vsel %vm1332_vm10, %v3642_v1, %v3655_v55 }
 0x28c   :  { %3662 = vmatprep.subr.mxu1 %v3644_v14 }
 0x28d   :  { %v4133_v29 = vpop.permute.xlu0 %4132 }
 0x28e   :  { %v3886_v57 = vpop.permute.xlu1 %3885  ;;  %4820 = vmatmul.mubr.msk.f32.vlgmr.msra.gmra.mrb[4].mxu1 %vm2477_vm2, %v3409_v46 }
 0x28f   :  { %3663 = vmatpush1.msra.mxu1 %v3643_v56  ;;  %3726 = vmatprep.mubr.f32.mxu1 %v4992_v5  ;;  %v3894_v9 = vsel %vm1584_vm11, %v3884_v48, %v3886_v57  ;;  %v3895_v8 = vsel %vm1584_vm11, %v3886_v57, %v3888_v53 }
 0x290   :  { %3733 = vmatprep.subr.mxu1 %v3646_v25 }
 0x291   :  { %v4131_v37 = vpop.permute.xlu0 %4130 }
 0x292   :  { %v3908_v58 = vpop.permute.xlu1 %3907  ;;  %4821 = vmatmul.mubr.msk.f32.vlgmr.msra.gmra.mrb[0].mxu1 %vm2477_vm2, %v3659_v52  ;;  %v4142_v19 = vsel %vm1846_vm13, %v4131_v37, %v4133_v29 }
 0x293   :  { %3734 = vmatpush1.msra.mxu1 %v3645_v32  ;;  %3797 = vmatprep.mubr.f32.mxu1 %v4992_v5 }
 0x294   :  { %3804 = vmatprep.subr.mxu1 %v3657_v59 }
 0x295   :  { %v3892_v61 = vpop.permute.xlu0 %3891 }
 0x296   :  { %v3890_v6 = vpop.permute.xlu1 %3889  ;;  %4822 = vmatmul.mubr.msk.f32.vlgmr.msra.gmra.mrb[2].mxu1 %vm2477_vm2, %v3659_v52 }
 0x297   :  { %3805 = vmatpush1.msra.mxu1 %v3647_v0  ;;  %3868 = vmatprep.mubr.f32.mxu1 %v4992_v5  ;;  %v3896_v4 = vsel %vm1584_vm11, %v3888_v53, %v3890_v6  ;;  %v3897_v15 = vsel %vm1584_vm11, %v3890_v6, %v3892_v61 }
 0x298   :  { %3911 = vmatprep.subr.mxu1 %v3894_v9 }
 0x299   :  { %v4137_v13 = vpop.permute.xlu0 %4136 }
 0x29a   :  { %v3904_v11 = vpop.permute.xlu1 %3903  ;;  %4823 = vmatmul.mubr.msk.f32.vlgmr.msra.gmra.mrb[4].mxu1 %vm2477_vm2, %v3659_v52 }
 0x29b   :  { %3912 = vmatpush1.msra.mxu1 %v3893_v10  ;;  %3975 = vmatprep.mubr.f32.mxu1 %v4992_v5  ;;  %v3906_v16 = vsel %vm1594_vm12, %v3897_v15, %v3904_v11 }
 0x29c   :  { %3982 = vmatprep.subr.mxu1 %v3896_v4 }
 0x29d   :  { %v4382_v3 = vpop.permute.xlu0 %4381 }
 0x29e   :  { %v4135_v7 = vpop.permute.xlu1 %4134  ;;  %4824 = vmatmul.mubr.msk.f32.vlgmr.msra.gmra.mrb[0].mxu1 %vm2477_vm2, %v3908_v58 }
 0x29f   :  { %3983 = vmatpush1.msra.mxu1 %v3895_v8  ;;  %4046 = vmatprep.mubr.f32.mxu1 %v4992_v5  ;;  %v4143_v18 = vsel %vm1846_vm13, %v4133_v29, %v4135_v7  ;;  %v4144_v26 = vsel %vm1846_vm13, %v4135_v7, %v4137_v13 }
 0x2a0   :  { %4053 = vmatprep.subr.mxu1 %v3904_v11 }
 0x2a1   :  { %v4141_v22 = vpop.permute.xlu0 %4140 }
 0x2a2   :  { %v4157_v17 = vpop.permute.xlu1 %4156  ;;  %4825 = vmatmul.mubr.msk.f32.vlgmr.msra.gmra.mrb[2].mxu1 %vm2477_vm2, %v3908_v58 }
 0x2a3   :  { %4054 = vmatpush1.msra.mxu1 %v3906_v16  ;;  %4117 = vmatprep.mubr.f32.mxu1 %v4992_v5 }
 0x2a4   :  { %4160 = vmatprep.subr.mxu1 %v4143_v18 }
 0x2a5   :  { %v4380_v28 = vpop.permute.xlu0 %4379 }
 0x2a6   :  { %v4139_v21 = vpop.permute.xlu1 %4138  ;;  %4826 = vmatmul.mubr.msk.f32.vlgmr.msra.gmra.mrb[4].mxu1 %vm2477_vm2, %v3908_v58  ;;  %v4391_v60 = vsel %vm2108_vm15, %v4380_v28, %v4382_v3 }
 0x2a7   :  { %4161 = vmatpush1.msra.mxu1 %v4142_v19  ;;  %v4145_v23 = vsel %vm1846_vm13, %v4137_v13, %v4139_v21  ;;  %4224 = vmatprep.mubr.f32.mxu1 %v4992_v5  ;;  %v4146_v30 = vsel %vm1846_vm13, %v4139_v21, %v4141_v22 }
 0x2a8   :  { %4231 = vmatprep.subr.mxu1 %v4145_v23 }
 0x2a9   :  { %v4386_v39 = vpop.permute.xlu0 %4385 }
 0x2aa   :  { %v4153_v27 = vpop.permute.xlu1 %4152  ;;  %4827 = vmatmul.mubr.msk.f32.vlgmr.msra.gmra.mrb[0].mxu1 %vm2477_vm2, %v4157_v17 }
 0x2ab   :  { %4232 = vmatpush1.msra.mxu1 %v4144_v26  ;;  %4295 = vmatprep.mubr.f32.mxu1 %v4992_v5  ;;  %v4155_v33 = vsel %vm5716_vm0, %v4146_v30, %v4153_v27 }
 0x2ac   :  { %4302 = vmatprep.subr.mxu1 %v4153_v27 }
 0x2ad   :  { %v4390_v43 = vpop.permute.xlu0 %4389 }
 0x2ae   :  { %v4384_v34 = vpop.permute.xlu1 %4383  ;;  %4828 = vmatmul.mubr.msk.f32.vlgmr.msra.gmra.mrb[2].mxu1 %vm2477_vm2, %v4157_v17 }
 0x2af   :  { %4303 = vmatpush1.msra.mxu1 %v4155_v33  ;;  %v4392_v35 = vsel %vm2108_vm15, %v4382_v3, %v4384_v34  ;;  %4366 = vmatprep.mubr.f32.mxu1 %v4992_v5  ;;  %v4393_v42 = vsel %vm2108_vm15, %v4384_v34, %v4386_v39 }
 0x2b0   :  { %4409 = vmatprep.subr.mxu1 %v4392_v35 }
 0x2b2   :  { %v4406_v38 = vpop.permute.xlu1 %4405  ;;  %4829 = vmatmul.mubr.msk.f32.vlgmr.msra.gmra.mrb[4].mxu1 %vm2477_vm2, %v4157_v17 }
 0x2b3   :  { %4410 = vmatpush1.msra.mxu1 %v4391_v60  ;;  %4473 = vmatprep.mubr.f32.mxu1 %v4992_v5 }
 0x2b6   :  { %v4388_v40 = vpop.permute.xlu1 %4387  ;;  %4830 = vmatmul.mubr.msk.f32.vlgmr.msra.gmra.mrb[0].mxu1 %vm2477_vm2, %v4406_v38 }
 0x2b7   :  { %v4394_v41 = vsel %vm2108_vm15, %v4386_v39, %v4388_v40  ;;  %4544 = vmatprep.mubr.f32.mxu1 %v4992_v5  ;;  %v4395_v44 = vsel %vm2108_vm15, %v4388_v40, %v4390_v43 }
 0x2b8   :  { %4480 = vmatprep.subr.mxu1 %v4394_v41 }
 0x2b9   :  { %4481 = vmatpush1.msra.mxu1 %v4393_v42 }
 0x2ba   :  { %v4402_v45 = vpop.permute.xlu1 %4401  ;;  %4831 = vmatmul.mubr.msk.f32.vlgmr.msra.gmra.mrb[2].mxu1 %vm2477_vm2, %v4406_v38 }
 0x2bb   :  { %v4404_v46 = vsel %vm2118_vm14, %v4395_v44, %v4402_v45  ;;  %4551 = vmatprep.subr.mxu1 %v4402_v45  ;;  %4615 = vmatprep.mubr.f32.mxu1 %v4992_v5 }
 0x2bc   :  { %4552 = vmatpush1.msra.mxu1 %v4404_v46 }
 0x2be   :  { %4832 = vmatmul.mubr.msk.f32.vlgmr.msra.gmra.mrb[4].mxu1 %vm2477_vm2, %v4406_v38  ;;  %v4632_v47 = vpop.permute.xlu0 %4631 }
 0x389   :  { %v4475_v48 = vpop.f32.mrb[0].mxu1 }
 0x38a   :  { %v4634_v49 = vadd.f32 %v4632_v47, %v4475_v48  ;;  %v4477_v50 = vpop.f32.mrb[1].mxu1 }
 0x38b   :  { %v4635_v51 = vadd.f32 %v4632_v47, %v4477_v50 }
 0x38c   :  { %v4640_v52 = vmax.f32 %v4634_v49, 0.0 }
 0x38d   :  { %v4641_v53 = vmax.f32 %v4635_v51, 0.0  ;;  %v4546_v54 = vpop.f32.mrb[2].mxu1 }
 0x38e   :  { %v4646_v1 = vmul.f32 %v4640_v52, %v5411_v12  ;;  %v4636_v55 = vadd.f32 %v4632_v47, %v4546_v54  ;;  %v4548_v14 = vpop.f32.mrb[3].mxu1 }
 0x38f   :  { %v4647_v29 = vmul.f32 %v4641_v53, %v5413_v2  ;;  %v4637_v56 = vadd.f32 %v4632_v47, %v4548_v14 }
 0x390   :  { %v4642_v57 = vmax.f32 %v4636_v55, 0.0 }
 0x391   :  { %v4652_v5 = vadd.f32 %v4647_v29, %v4646_v1  ;;  %v4643_v25 = vmax.f32 %v4637_v56, 0.0  ;;  %v4617_v37 = vpop.f32.mrb[4].mxu1 }
 0x392   :  { %v4648_v32 = vmul.f32 %v4642_v57, %v5427_v20  ;;  %v4638_v58 = vadd.f32 %v4632_v47, %v4617_v37  ;;  %v4619_v59 = vpop.f32.mrb[5].mxu1  ;;  %v4698_v20 = vld [vmem:[#allocation2] sm:$0x1] }
 0x393   :  { %v4649_v61 = vmul.f32 %v4643_v25, %v5431_v24  ;;  %v4639_v0 = vadd.f32 %v4632_v47, %v4619_v59 }
 0x394   :  { %v4644_v6 = vmax.f32 %v4638_v58, 0.0  ;;  %4662 = vrot.lane.b32.xlu1 %v4648_v32, %s5020_s5  ;;  %v4654_v12 = vsel %vm4653_vm1, %v4648_v32, 0.0 }
 0x395   :  { %v4645_v9 = vmax.f32 %v4639_v0, 0.0  ;;  %4664 = vrot.lane.b32.xlu0 %v4649_v61, %s5020_s5  ;;  %v4655_v2 = vadd.f32 %v4654_v12, %v4652_v5 }
 0x396   :  { %v4650_v10 = vmul.f32 %v4644_v6, %v5446_v31  ;;  %v4683_v31 = vld [vmem:[%s5712_s6] sm:$0xff]  ;;  %s4717_s6 = sshll.u32 %s5021_s19, 4  ;;  %s4718_s6 = int_to_ptr.vmem [resolvable:$true] %s4717_s6 }
 0x397   :  { %v4651_v11 = vmul.f32 %v4645_v9, %v5460_v36  ;;  %s4966_s20 = scalar_lea.vmem %s4718_s6, 16  ;;  %s4970_s21 = scalar_lea.vmem %s4718_s6, 32 }
 0x398   :  { %4666 = vrot.lane.b32.xlu1 %v4650_v10, %s5020_s5  ;;  %p4967_p0 = scmp.ne.s32.totalorder %s4718_s6, %s4966_s20  ;;  %p4971_p1 = scmp.lt.s32.totalorder %s4718_s6, %s4718_s6 }
 0x399   :  { %4668 = vrot.lane.b32.xlu0 %v4651_v11, %s5020_s5  ;;  %p4972_p2 = scmp.lt.s32.totalorder %s4970_s21, %s4966_s20 }
 0x39b   :  { %p4973_p3 = por %p4972_p2, %p4971_p1 }
 0x39d   :  { %p4974_p4 = pnand %p4973_p3, %p4967_p0 }
 0x3bc   :  { %4656 = vadd.xlane.f32.xlu1 %v4655_v2 }
 0x3cd   :  { %4701 = vperm.xlu1 %4962, %v4698_v20  }
 0x406   :  { %v4663_v13 = vpop.permute.xlu1 %4662 }
 0x407   :  { %v4665_v24 = vpop.permute.xlu0 %4664 }
 0x408   :  { %v4671_v8 = vsel %vm4670_vm3, %v4663_v13, %v4665_v24 }
 0x40a   :  { %v4667_v4 = vpop.permute.xlu1 %4666 }
 0x40b   :  { %v4672_v7 = vsel %vm4670_vm3, %v4665_v24, %v4667_v4  ;;  %v4669_v15 = vpop.permute.xlu0 %4668 }
 0x40c   :  { %v4677_v3 = vadd.f32 %v4672_v7, %v4671_v8  ;;  %v4673_v16 = vsel %vm4670_vm3, %v4667_v4, %v4669_v15 }
 0x40d   :  { %v4678_v17 = vsel %vm4653_vm1, %v4673_v16, 0.0 }
 0x40e   :  { %v4679_v18 = vadd.f32 %v4678_v17, %v4677_v3 }
 0x410   :  { %4680 = vadd.xlane.f32.xlu0 %v4679_v18 }
 0x426   :  { %4686 = vperm.xlu0 %4961, %v4683_v31  }
 0x449   :  { %v4657_v19 = vpop.xlane.xlu1 %4656 }
 0x44d   :  { %v4702_v33 = vpop.permute.xlu1 %4701 }
 0x44e   :  { %v4707_v60 = vrot.slane %v4702_v33, %v2379_v63 }
 0x49d   :  { %v4681_v36 = vpop.xlane.xlu0 %4680 }
 0x49e   :  { %v4682_v22 = vsel %vm829_vm8, %v4657_v19, %v4681_v36 }
 0x4a5   :  { %v4687_v21 = vpop.permute.xlu0 %4686 }
 0x4a6   :  { %v4689_v23 = vmul.f32 %v4687_v21, %v4682_v22 }
 0x4a8   :  { %v4691_v26 = vsel %vm4690_vm4, %v4689_v23, 0.0 }
 0x4a9   :  { %v4692_v27 = vrot.slane %v4691_v26, 4 }
 0x4ab   :  { %v4693_v28 = vadd.f32 %v4692_v27, %v4691_v26 }
 0x4ad   :  { %v4694_v30 = vrot.slane %v4693_v28, 2 }
 0x4af   :  { %v4695_v34 = vadd.f32 %v4694_v30, %v4693_v28 }
 0x4b1   :  { %v4696_v35 = vrot.slane %v4695_v34, 1 }
 0x4b3   :  { %v4697_v38 = vadd.f32 %v4696_v35, %v4695_v34 }
 0x4b5   :  { %v4708_v39 = vadd.f32 %v4707_v60, %v4697_v38 }
 0x4b7   :  { %4710 = vst.msk [vmem:[#allocation3] sm:$0x1] %vm4709_vm5, %v4708_v39 }
 0x4b8   :  { %4977 = shalt.err (!%p4974_p4)
}
 0x4b9   :  { %s4978_s26 = scalar_lea.hbm %s5714_s8, 16 }
 0x4ba   :  { %p4979_p5 = scmp.ne.s32.totalorder %s5714_s8, %s4978_s26  ;;  %p4982_p6 = scmp.lt.u32.totalorder %s4978_s26, %s5714_s8 }
 0x4bc   :  { %p4984_p7 = pnand %p4982_p6, %p4979_p5 }
 0x4be   :  { %4987 = shalt.err (!%p4984_p7)
}
 0x4bf   :  { %4720 = dma.vmem_to_hbm [thread:$0]  %s4718_s6, 16, %s5714_s8, [#allocation4]  }
 0x4c0   :  { %4988 = dma.done.wait [#allocation4], 16  }
 0x4c1   :  { %4989 = vsyncadd [#allocation4], 4294967280 }
 0x4c2   :  { %4724 = vsyncpa [#allocation4], 1 }

</bundles_post_ra>
